<compile_context>
chip_gen: v5e
topology: v5e:2x2
jax: 0.10.0
libtpu: 0.0.40
codegen_flags: <defaults>
</compile_context>

<pallas_src>
import functools
import math

import jax
import jax.numpy as jnp
from jax.experimental import pallas as pl
from jax.experimental.pallas import tpu as pltpu


# ---------------------------------------------------------------------------
# Elementwise helpers (f32 domain).
# ---------------------------------------------------------------------------

def _erf_f32(x):
    # Abramowitz & Stegun 7.1.26 polynomial erf (|err| < 1.5e-7), built only
    # from exp / mul / add / select which all have Mosaic lowerings.
    p = 0.3275911
    a1, a2, a3, a4, a5 = (0.254829592, -0.284496736, 1.421413741,
                          -1.453152027, 1.061405429)
    z = jnp.abs(x)
    t = 1.0 / (1.0 + p * z)
    poly = ((((a5 * t + a4) * t + a3) * t + a2) * t + a1) * t
    e = 1.0 - poly * jnp.exp(-z * z)
    return jnp.where(x < 0.0, -e, e)


def _gelu_exact(x):
    # HF ACT2FN["gelu"] is the exact erf form.
    return 0.5 * x * (1.0 + _erf_f32(x * (1.0 / math.sqrt(2.0))))


def _layer_norm(x, gamma, beta, eps):
    # PyTorch LayerNorm (biased variance); gamma folded into the rsqrt scale.
    mean = jnp.mean(x, axis=-1, keepdims=True)
    var = jnp.mean(jnp.square(x - mean), axis=-1, keepdims=True)
    return (x - mean) * (gamma * jax.lax.rsqrt(var + eps)) + beta


# ---------------------------------------------------------------------------
# Kernel 1: self-attention + SelfOutput (dense + residual + LayerNorm1).
# Grid = (B, S // TQ); query-tile axis is innermost ("arbitrary").
# ---------------------------------------------------------------------------

def splinter_attention_kernel(
    x_ref,       # (S, H)   full hidden-state row of batch b (activation dtype)
    mask_ref,    # (1, S)   additive attention mask (0 / -1e9), f32
    wq_ref, wk_ref, wv_ref, wo_ref,   # (H, H) bf16
    bq_ref, bk_ref, bv_ref, bo_ref,   # (1, H) f32
    g1_ref, be1_ref,                  # (1, H) f32  LayerNorm1 gamma / beta
    o_ref,       # (TQ, H)  attention_output tile (activation dtype)
    kt_ref,      # scratch (H, S)  bf16 : K^T, computed once per batch row
    v_ref,       # scratch (S, H)  bf16 : V,   computed once per batch row
    ctx_ref,     # scratch (TQ, H) bf16 : all-head context for the Wo matmul
    *,
    num_heads,
    eps,
):
    S, H = x_ref.shape
    TQ = o_ref.shape[0]
    hd = H // num_heads
    scale = 1.0 / math.sqrt(hd)

    # K / V projections once per batch row (the query-tile grid axis is the
    # innermost, sequential axis).  K is transposed once (one full XLU
    # transpose) so the per-head QK^T needs no per-head transposes.
    @pl.when(pl.program_id(1) == 0)
    def _():
        xa = x_ref[...].astype(jnp.bfloat16)
        k = jnp.dot(xa, wk_ref[...], preferred_element_type=jnp.float32) + bk_ref[...]
        v = jnp.dot(xa, wv_ref[...], preferred_element_type=jnp.float32) + bv_ref[...]
        kt_ref[...] = k.T.astype(jnp.bfloat16)
        v_ref[...] = v.astype(jnp.bfloat16)

    q_start = pl.multiple_of(pl.program_id(1) * TQ, 8)
    xq = x_ref[pl.ds(q_start, TQ), :]
    xq_f32 = xq.astype(jnp.float32)

    # Q projection for this query tile; 1/sqrt(hd) is folded into q once
    # (O(TQ*H)) instead of scaling every (TQ,S) score matrix.
    q = jnp.dot(xq.astype(jnp.bfloat16), wq_ref[...],
                preferred_element_type=jnp.float32) + bq_ref[...]
    q = (q * scale).astype(jnp.bfloat16)

    mask = mask_ref[...]                       # (1, S) broadcast over queries

    # Per-head attention.  Head contexts go into a (TQ, H) VMEM scratch so the
    # output projection is a single (TQ,H)x(H,H) MXU matmul.  Softmax
    # normalisation is deferred to after the PV matmul (EUP reciprocal on a
    # (TQ,1) column instead of an O(TQ*S) divide).
    for h in range(num_heads):
        sl = slice(h * hd, (h + 1) * hd)
        s = jnp.dot(q[:, sl], kt_ref[sl, :],
                    preferred_element_type=jnp.float32)          # (TQ, S)
        s = s + mask
        s = s - jnp.max(s, axis=-1, keepdims=True)
        p = jnp.exp(s)
        denom = jnp.sum(p, axis=-1, keepdims=True)
        # TODO(synk): attention-probs dropout is identity in eval mode.
        ctx_h = jnp.dot(p.astype(jnp.bfloat16), v_ref[:, sl],
                        preferred_element_type=jnp.float32)      # (TQ, hd)
        ctx_h = ctx_h * pl.reciprocal(denom, approx=True)
        ctx_ref[:, sl] = ctx_h.astype(jnp.bfloat16)

    attn = jnp.dot(ctx_ref[...], wo_ref[...],
                   preferred_element_type=jnp.float32) + bo_ref[...]
    # TODO(synk): hidden dropout is identity in eval mode.
    y = attn + xq_f32                                            # residual
    o_ref[...] = _layer_norm(y, g1_ref[...], be1_ref[...], eps).astype(o_ref.dtype)


# ---------------------------------------------------------------------------
# Kernel 2: Intermediate + Output (dense -> GELU -> dense -> residual -> LN2).
# Grid = (B, S // TS, I // TI); the I axis is the reduction ("arbitrary").
# ---------------------------------------------------------------------------

def splinter_ffn_kernel(
    x_ref,            # (TS, H)  attention_output tile (activation dtype)
    w1_ref,           # (H, TI)  bf16
    b1_ref,           # (1, TI)  f32
    w2_ref,           # (TI, H)  bf16
    b2_ref,           # (1, H)   f32
    g2_ref, be2_ref,  # (1, H)   f32  LayerNorm2 gamma / beta
    o_ref,            # (TS, H)
    acc_ref,          # scratch (TS, H) f32
    *,
    eps,
):
    i = pl.program_id(2)

    @pl.when(i == 0)
    def _():
        acc_ref[...] = jnp.zeros_like(acc_ref)

    h1 = jnp.dot(x_ref[...].astype(jnp.bfloat16), w1_ref[...],
                 preferred_element_type=jnp.float32) + b1_ref[...]
    h1 = _gelu_exact(h1)
    acc_ref[...] += jnp.dot(h1.astype(jnp.bfloat16), w2_ref[...],
                            preferred_element_type=jnp.float32)

    @pl.when(i == pl.num_programs(2) - 1)
    def _():
        # TODO(synk): hidden dropout is identity in eval mode.
        y = acc_ref[...] + b2_ref[...] + x_ref[...].astype(jnp.float32)
        o_ref[...] = _layer_norm(y, g2_ref[...], be2_ref[...], eps).astype(o_ref.dtype)


# ---------------------------------------------------------------------------
# Wrapper
# ---------------------------------------------------------------------------

def _pick_tile(dim, cap, align):
    """Largest multiple of `align` <= cap that divides `dim`, else `dim`."""
    if dim <= cap:
        return dim
    t = (cap // align) * align
    while t >= align:
        if dim % t == 0:
            return t
        t -= align
    return dim


def _vmem_capacity_bytes():
    try:
        return int(pltpu.get_tpu_info().vmem_capacity_bytes)
    except Exception:
        return 64 * 1024 * 1024     # conservative (v7x-sized) fallback


def _vmem_limit(est_bytes, vmem_cap):
    return int(min(max(2 * est_bytes, 32 << 20), int(vmem_cap * 0.9)))


def splinter_layer(hidden_states, attention_mask, params, *, num_heads,
                   eps=1e-12, q_tile=None, s_tile=None, i_tile=None,
                   single_buffer_weights=True):
    """SplinterLayer forward.

    hidden_states:  (B, S, H) float
    attention_mask: (B, 1, S) additive mask (0 keep, large negative masked)
    params: linear weights as (in, out) matrices, biases as (1, out),
            LayerNorm gamma/beta as (1, H).
    """
    B, S, H = hidden_states.shape
    I = params["w1"].shape[1]
    act_dtype = hidden_states.dtype
    act_bytes = hidden_states.dtype.itemsize

    vmem_cap = _vmem_capacity_bytes()
    big_vmem = vmem_cap >= 100 * 1024 * 1024   # v5e/v6e: 128 MiB; v7x: 64 MiB

    # Generation-aware tile sizes (smaller on v7x's 64 MiB VMEM).
    TQ = q_tile or _pick_tile(S, 512 if big_vmem else 256, 8)
    TS = s_tile or _pick_tile(S, 512 if big_vmem else 256, 8)
    TI = i_tile or _pick_tile(I, 2048 if big_vmem else 1024, 128)
    assert S % TQ == 0 and S % TS == 0 and I % TI == 0

    f32, bf16 = jnp.float32, jnp.bfloat16

    # bf16 weights: full-rate MXU and half the HBM->VMEM DMA bytes.  Biases
    # and LayerNorm params stay f32 (added in the f32 accumulator domain).
    wq, wk, wv, wo = (params[k].astype(bf16) for k in ("wq", "wk", "wv", "wo"))
    w1, w2 = params["w1"].astype(bf16), params["w2"].astype(bf16)
    bq, bk, bv, bo = (params[k].astype(f32) for k in ("bq", "bk", "bv", "bo"))
    b1, b2 = params["b1"].astype(f32), params["b2"].astype(f32)
    ln1_g, ln1_b = params["ln1_g"].astype(f32), params["ln1_b"].astype(f32)
    ln2_g, ln2_b = params["ln2_g"].astype(f32), params["ln2_b"].astype(f32)
    mask = attention_mask.astype(f32)

    # Constant-index weight blocks never get re-fetched; single-buffer them so
    # they are not double-allocated in VMEM.
    buf1 = dict(pipeline_mode=pl.Buffered(1)) if single_buffer_weights else {}

    # ---------------- attention + SelfOutput ----------------
    n_q = S // TQ

    def const2(shape):
        return pl.BlockSpec(shape, lambda b, q: (0,) * len(shape), **buf1)

    x_row_spec = pl.BlockSpec((None, S, H), lambda b, q: (b, 0, 0))
    mask_spec = pl.BlockSpec((None, 1, S), lambda b, q: (b, 0, 0))
    out_q_spec = pl.BlockSpec((None, TQ, H), lambda b, q: (b, q, 0))

    est_attn = (4 * H * H * 2 + 6 * H * 4                    # bf16 weights + f32 vectors
                + 2 * (S * H * act_bytes + S * 4)            # x row + mask buffers
                + 2 * TQ * H * act_bytes                     # output blocks
                + (H * S + S * H + TQ * H) * 2               # kT / V / ctx scratch
                + 4 * TQ * S * 4 + 6 * TQ * H * 4            # score / q / attn temps
                + 2 * S * H * 4)                             # K/V projection temps

    attn_out = pl.pallas_call(
        functools.partial(splinter_attention_kernel, num_heads=num_heads, eps=eps),
        out_shape=jax.ShapeDtypeStruct((B, S, H), act_dtype),
        grid_spec=pltpu.PrefetchScalarGridSpec(
            num_scalar_prefetch=0,
            grid=(B, n_q),
            in_specs=[
                x_row_spec, mask_spec,
                const2((H, H)), const2((H, H)), const2((H, H)), const2((H, H)),
                const2((1, H)), const2((1, H)), const2((1, H)), const2((1, H)),
                const2((1, H)), const2((1, H)),
            ],
            out_specs=out_q_spec,
            scratch_shapes=[
                pltpu.VMEM((H, S), bf16),    # K^T
                pltpu.VMEM((S, H), bf16),    # V
                pltpu.VMEM((TQ, H), bf16),   # all-head context
            ],
        ),
        compiler_params=pltpu.CompilerParams(
            # q-axis carries the per-row K/V scratch -> "arbitrary"; batch is
            # "parallel" for megacore sharding.
            dimension_semantics=("parallel", "arbitrary"),
            vmem_limit_bytes=_vmem_limit(est_attn, vmem_cap),
        ),
    )(hidden_states, mask, wq, wk, wv, wo, bq, bk, bv, bo, ln1_g, ln1_b)

    # ---------------- Intermediate + Output (FFN) ----------------
    n_s = S // TS
    n_i = I // TI

    def const3(shape):
        return pl.BlockSpec(shape, lambda b, s, i: (0,) * len(shape), **buf1)

    x_ffn_spec = pl.BlockSpec((None, TS, H), lambda b, s, i: (b, s, 0))
    out_ffn_spec = pl.BlockSpec((None, TS, H), lambda b, s, i: (b, s, 0))
    w1_spec = pl.BlockSpec((H, TI), lambda b, s, i: (0, i))
    b1_spec = pl.BlockSpec((1, TI), lambda b, s, i: (0, i))
    w2_spec = pl.BlockSpec((TI, H), lambda b, s, i: (i, 0))

    est_ffn = (2 * (H * TI + TI * H) * 2 + 2 * TI * 4 + 6 * H * 4
               + 4 * TS * H * act_bytes
               + TS * H * 4 + 3 * TS * TI * 4)

    layer_out = pl.pallas_call(
        functools.partial(splinter_ffn_kernel, eps=eps),
        out_shape=jax.ShapeDtypeStruct((B, S, H), act_dtype),
        grid_spec=pltpu.PrefetchScalarGridSpec(
            num_scalar_prefetch=0,
            grid=(B, n_s, n_i),
            in_specs=[
                x_ffn_spec,
                w1_spec, b1_spec, w2_spec,
                const3((1, H)), const3((1, H)), const3((1, H)),
            ],
            out_specs=out_ffn_spec,
            scratch_shapes=[pltpu.VMEM((TS, H), f32)],
        ),
        compiler_params=pltpu.CompilerParams(
            dimension_semantics=("parallel", "parallel", "arbitrary"),
            vmem_limit_bytes=_vmem_limit(est_ffn, vmem_cap),
        ),
    )(attn_out, w1, b1, w2, b2, ln2_g, ln2_b)

    return layer_out


# ---------------------------------------------------------------------------
# Pure-JAX reference (mirrors the PyTorch forward, eval mode, exact GELU).
# ---------------------------------------------------------------------------

def reference_splinter_layer(hidden_states, attention_mask, params, *,
                             num_heads, eps=1e-12):
    B, S, H = hidden_states.shape
    hd = H // num_heads
    x = hidden_states.astype(jnp.float32)

    q = x @ params["wq"] + params["bq"]
    k = x @ params["wk"] + params["bk"]
    v = x @ params["wv"] + params["bv"]

    def split(t):  # (B, S, H) -> (B, nh, S, hd)
        return t.reshape(B, S, num_heads, hd).transpose(0, 2, 1, 3)

    q, k, v = split(q), split(k), split(v)
    scores = jnp.einsum("bhqd,bhkd->bhqk", q, k) / math.sqrt(hd)
    scores = scores + attention_mask[:, None, :, :]
    probs = jax.nn.softmax(scores, axis=-1)
    ctx = jnp.einsum("bhqk,bhkd->bhqd", probs, v)
    ctx = ctx.transpose(0, 2, 1, 3).reshape(B, S, H)

    attn = ctx @ params["wo"] + params["bo"]
    attn = _layer_norm(attn + x, params["ln1_g"], params["ln1_b"], eps)

    h1 = jax.nn.gelu(attn @ params["w1"] + params["b1"], approximate=False)
    h2 = h1 @ params["w2"] + params["b2"]
    return _layer_norm(h2 + attn, params["ln2_g"], params["ln2_b"], eps)


# ---------------------------------------------------------------------------
# Self-test
# ---------------------------------------------------------------------------

if __name__ == "__main__":
    # Small synthetic Splinter config (head_dim = 8, exercises all code paths).
    hidden_size = 32
    num_attention_heads = 4
    intermediate_size = 256
    layer_norm_eps = 1e-12
    B, S = 2, 16

    key = jax.random.PRNGKey(0)
    ks = jax.random.split(key, 14)

    def w(k, shape):
        return 0.05 * jax.random.normal(k, shape, jnp.float32)

    # Linear weights stored as (in, out) (PyTorch weight transposed).
    params = dict(
        wq=w(ks[0], (hidden_size, hidden_size)), bq=w(ks[1], (1, hidden_size)),
        wk=w(ks[2], (hidden_size, hidden_size)), bk=w(ks[3], (1, hidden_size)),
        wv=w(ks[4], (hidden_size, hidden_size)), bv=w(ks[5], (1, hidden_size)),
        wo=w(ks[6], (hidden_size, hidden_size)), bo=w(ks[7], (1, hidden_size)),
        ln1_g=jnp.ones((1, hidden_size), jnp.float32),
        ln1_b=jnp.zeros((1, hidden_size), jnp.float32),
        w1=w(ks[8], (hidden_size, intermediate_size)),
        b1=w(ks[9], (1, intermediate_size)),
        w2=w(ks[10], (intermediate_size, hidden_size)),
        b2=w(ks[11], (1, hidden_size)),
        ln2_g=jnp.ones((1, hidden_size), jnp.float32),
        ln2_b=jnp.zeros((1, hidden_size), jnp.float32),
    )

    hidden_states = jax.random.normal(ks[12], (B, S, hidden_size), jnp.float32)

    # Additive extended attention mask: mask the last 4 keys of batch row 1.
    attention_mask = jnp.zeros((B, 1, S), jnp.float32)
    attention_mask = attention_mask.at[1, 0, S - 4:].set(-1e9)

    with jax.default_matmul_precision("highest"):
        ref = jax.block_until_ready(
            reference_splinter_layer(hidden_states, attention_mask, params,
                                     num_heads=num_attention_heads,
                                     eps=layer_norm_eps))

    def run(**tiles):
        try:
            out = splinter_layer(hidden_states, attention_mask, params,
                                 num_heads=num_attention_heads,
                                 eps=layer_norm_eps,
                                 single_buffer_weights=True, **tiles)
        except Exception:
            # TODO(synk): fall back to default double-buffering if this JAX
            # build rejects pl.Buffered(1) on constant weight blocks.
            out = splinter_layer(hidden_states, attention_mask, params,
                                 num_heads=num_attention_heads,
                                 eps=layer_norm_eps,
                                 single_buffer_weights=False, **tiles)
        return jax.block_until_ready(out)

    # (a) single-tile path, (b) forced multi-tile path (query / seq / I tiling,
    # accumulator init/finalize) on the same small problem.
    for tiles in (dict(), dict(q_tile=8, s_tile=8, i_tile=128)):
        out = run(**tiles)
        assert out.shape == (B, S, hidden_size)
        max_err = float(jnp.max(jnp.abs(out - ref)))
        assert jnp.allclose(out, ref, atol=3e-2, rtol=3e-2), \
            f"tiles={tiles} max_err={max_err}"

    print("KERNEL_OK")
</pallas_src>

<mosaic_0001>
module attributes {stable_mosaic.version = 11 : i64} {
  func.func @splinter_attention_kernel(%arg0: i32, %arg1: i32, %arg2: memref<1x16x32xf32, #tpu.memory_space<vmem>>, %arg3: memref<1x1x16xf32, #tpu.memory_space<vmem>>, %arg4: memref<32x32xbf16, #tpu.memory_space<vmem>>, %arg5: memref<32x32xbf16, #tpu.memory_space<vmem>>, %arg6: memref<32x32xbf16, #tpu.memory_space<vmem>>, %arg7: memref<32x32xbf16, #tpu.memory_space<vmem>>, %arg8: memref<1x32xf32, #tpu.memory_space<vmem>>, %arg9: memref<1x32xf32, #tpu.memory_space<vmem>>, %arg10: memref<1x32xf32, #tpu.memory_space<vmem>>, %arg11: memref<1x32xf32, #tpu.memory_space<vmem>>, %arg12: memref<1x32xf32, #tpu.memory_space<vmem>>, %arg13: memref<1x32xf32, #tpu.memory_space<vmem>>, %arg14: memref<1x16x32xf32, #tpu.memory_space<vmem>>, %arg15: memref<32x16xbf16, #tpu.memory_space<vmem>>, %arg16: memref<16x32xbf16, #tpu.memory_space<vmem>>, %arg17: memref<16x32xbf16, #tpu.memory_space<vmem>>) attributes {dimension_semantics = [#tpu.dimension_semantics<parallel>, #tpu.dimension_semantics<arbitrary>], iteration_bounds = array<i64: 2, 1>, scalar_prefetch = 0 : i64, scratch_operands = 3 : i64, tpu.core_type = #tpu.core_type<tc>, window_params = [{transform_indices = @transform_0, window_bounds = array<i64: 1, 16, 32>}, {transform_indices = @transform_1, window_bounds = array<i64: 1, 1, 16>}, {pipeline_mode = #tpu.pipeline_mode<synchronous>, transform_indices = @transform_2, window_bounds = array<i64: 32, 32>}, {pipeline_mode = #tpu.pipeline_mode<synchronous>, transform_indices = @transform_3, window_bounds = array<i64: 32, 32>}, {pipeline_mode = #tpu.pipeline_mode<synchronous>, transform_indices = @transform_4, window_bounds = array<i64: 32, 32>}, {pipeline_mode = #tpu.pipeline_mode<synchronous>, transform_indices = @transform_5, window_bounds = array<i64: 32, 32>}, {pipeline_mode = #tpu.pipeline_mode<synchronous>, transform_indices = @transform_6, window_bounds = array<i64: 1, 32>}, {pipeline_mode = #tpu.pipeline_mode<synchronous>, transform_indices = @transform_7, window_bounds = array<i64: 1, 32>}, {pipeline_mode = #tpu.pipeline_mode<synchronous>, transform_indices = @transform_8, window_bounds = array<i64: 1, 32>}, {pipeline_mode = #tpu.pipeline_mode<synchronous>, transform_indices = @transform_9, window_bounds = array<i64: 1, 32>}, {pipeline_mode = #tpu.pipeline_mode<synchronous>, transform_indices = @transform_10, window_bounds = array<i64: 1, 32>}, {pipeline_mode = #tpu.pipeline_mode<synchronous>, transform_indices = @transform_11, window_bounds = array<i64: 1, 32>}, {transform_indices = @transform_12, window_bounds = array<i64: 1, 16, 32>}]} {
    %c0_i32 = arith.constant 0 : i32
    %0 = arith.cmpi eq, %arg1, %c0_i32 : i32
    %1 = arith.extui %0 : i1 to i32
    %c0_i32_0 = arith.constant 0 : i32
    %2 = arith.cmpi ne, %1, %c0_i32_0 : i32
    scf.if %2 {
      %c0_66 = arith.constant 0 : index
      %c0_67 = arith.constant 0 : index
      %c0_68 = arith.constant 0 : index
      %133 = vector.load %arg2[%c0_66, %c0_67, %c0_68] : memref<1x16x32xf32, #tpu.memory_space<vmem>>, vector<1x16x32xf32>
      %134 = vector.shape_cast %133 : vector<1x16x32xf32> to vector<16x32xf32>
      %135 = arith.truncf %134 : vector<16x32xf32> to vector<16x32xbf16>
      %c0_69 = arith.constant 0 : index
      %c0_70 = arith.constant 0 : index
      %136 = vector.load %arg5[%c0_69, %c0_70] : memref<32x32xbf16, #tpu.memory_space<vmem>>, vector<32x32xbf16>
      %cst_71 = arith.constant dense<0.000000e+00> : vector<16x32xf32>
      %137 = tpu.matmul %135, %136, %cst_71 {dimension_numbers = #tpu.dot_dimension_numbers<[1], [0], [0], [1], [0, 0, 1, 1], [], []>} : vector<16x32xbf16>, vector<32x32xbf16>, vector<16x32xf32> -> vector<16x32xf32>
      %c0_72 = arith.constant 0 : index
      %c0_73 = arith.constant 0 : index
      %138 = vector.load %arg9[%c0_72, %c0_73] : memref<1x32xf32, #tpu.memory_space<vmem>>, vector<1x32xf32>
      %139 = vector.broadcast %138 : vector<1x32xf32> to vector<16x32xf32>
      %140 = arith.addf %137, %139 : vector<16x32xf32>
      %c0_74 = arith.constant 0 : index
      %c0_75 = arith.constant 0 : index
      %141 = vector.load %arg6[%c0_74, %c0_75] : memref<32x32xbf16, #tpu.memory_space<vmem>>, vector<32x32xbf16>
      %cst_76 = arith.constant dense<0.000000e+00> : vector<16x32xf32>
      %142 = tpu.matmul %135, %141, %cst_76 {dimension_numbers = #tpu.dot_dimension_numbers<[1], [0], [0], [1], [0, 0, 1, 1], [], []>} : vector<16x32xbf16>, vector<32x32xbf16>, vector<16x32xf32> -> vector<16x32xf32>
      %c0_77 = arith.constant 0 : index
      %c0_78 = arith.constant 0 : index
      %143 = vector.load %arg10[%c0_77, %c0_78] : memref<1x32xf32, #tpu.memory_space<vmem>>, vector<1x32xf32>
      %144 = vector.broadcast %143 : vector<1x32xf32> to vector<16x32xf32>
      %145 = arith.addf %142, %144 : vector<16x32xf32>
      %146 = tpu.transpose %140, [1, 0] : vector<16x32xf32> -> vector<32x16xf32>
      %147 = arith.truncf %146 : vector<32x16xf32> to vector<32x16xbf16>
      %c0_79 = arith.constant 0 : index
      %c0_80 = arith.constant 0 : index
      %148 = vector.load %arg15[%c0_79, %c0_80] : memref<32x16xbf16, #tpu.memory_space<vmem>>, vector<32x16xbf16>
      tpu.vector_store %arg15[%c0_79, %c0_80], %147 {strides = array<i32>} : memref<32x16xbf16, #tpu.memory_space<vmem>>, vector<32x16xbf16>,
      %149 = arith.truncf %145 : vector<16x32xf32> to vector<16x32xbf16>
      %c0_81 = arith.constant 0 : index
      %c0_82 = arith.constant 0 : index
      %150 = vector.load %arg16[%c0_81, %c0_82] : memref<16x32xbf16, #tpu.memory_space<vmem>>, vector<16x32xbf16>
      tpu.vector_store %arg16[%c0_81, %c0_82], %149 {strides = array<i32>} : memref<16x32xbf16, #tpu.memory_space<vmem>>, vector<16x32xbf16>,
    } else {
    }
    %c16_i32 = arith.constant 16 : i32
    %3 = arith.muli %arg1, %c16_i32 : i32
    %4 = tpu.assume_multiple %3, 8 : i32
    %c0 = arith.constant 0 : index
    %5 = arith.index_cast %4 : i32 to index
    %c0_1 = arith.constant 0 : index
    %6 = vector.load %arg2[%c0, %5, %c0_1] : memref<1x16x32xf32, #tpu.memory_space<vmem>>, vector<1x16x32xf32>
    %7 = vector.shape_cast %6 : vector<1x16x32xf32> to vector<16x32xf32>
    %8 = arith.truncf %7 : vector<16x32xf32> to vector<16x32xbf16>
    %c0_2 = arith.constant 0 : index
    %c0_3 = arith.constant 0 : index
    %9 = vector.load %arg4[%c0_2, %c0_3] : memref<32x32xbf16, #tpu.memory_space<vmem>>, vector<32x32xbf16>
    %cst = arith.constant dense<0.000000e+00> : vector<16x32xf32>
    %10 = tpu.matmul %8, %9, %cst {dimension_numbers = #tpu.dot_dimension_numbers<[1], [0], [0], [1], [0, 0, 1, 1], [], []>} : vector<16x32xbf16>, vector<32x32xbf16>, vector<16x32xf32> -> vector<16x32xf32>
    %c0_4 = arith.constant 0 : index
    %c0_5 = arith.constant 0 : index
    %11 = vector.load %arg8[%c0_4, %c0_5] : memref<1x32xf32, #tpu.memory_space<vmem>>, vector<1x32xf32>
    %12 = vector.broadcast %11 : vector<1x32xf32> to vector<16x32xf32>
    %13 = arith.addf %10, %12 : vector<16x32xf32>
    %cst_6 = arith.constant 0.353553385 : f32
    %14 = vector.broadcast %cst_6 : f32 to vector<16x32xf32>
    %15 = arith.mulf %13, %14 : vector<16x32xf32>
    %16 = arith.truncf %15 : vector<16x32xf32> to vector<16x32xbf16>
    %c0_7 = arith.constant 0 : index
    %c0_8 = arith.constant 0 : index
    %c0_9 = arith.constant 0 : index
    %17 = vector.load %arg3[%c0_7, %c0_8, %c0_9] : memref<1x1x16xf32, #tpu.memory_space<vmem>>, vector<1x1x16xf32>
    %18 = vector.shape_cast %17 : vector<1x1x16xf32> to vector<1x16xf32>
    %19 = vector.extract_strided_slice %16 {offsets = [0, 0], sizes = [16, 8], strides = [1, 1]} : vector<16x32xbf16> to vector<16x8xbf16>
    %c0_10 = arith.constant 0 : index
    %c0_11 = arith.constant 0 : index
    %20 = vector.load %arg15[%c0_10, %c0_11] : memref<32x16xbf16, #tpu.memory_space<vmem>>, vector<8x16xbf16>
    %cst_12 = arith.constant dense<0.000000e+00> : vector<16x16xf32>
    %21 = tpu.matmul %19, %20, %cst_12 {dimension_numbers = #tpu.dot_dimension_numbers<[1], [0], [0], [1], [0, 0, 1, 1], [], []>} : vector<16x8xbf16>, vector<8x16xbf16>, vector<16x16xf32> -> vector<16x16xf32>
    %22 = vector.broadcast %18 : vector<1x16xf32> to vector<16x16xf32>
    %23 = arith.addf %21, %22 : vector<16x16xf32>
    %cst_13 = arith.constant dense<0xFF800000> : vector<16xf32>
    %24 = vector.multi_reduction <maximumf>, %23, %cst_13 [1] : vector<16x16xf32> to vector<16xf32>
    %25 = vector.shape_cast %24 : vector<16xf32> to vector<16x1xf32>
    %26 = vector.broadcast %25 : vector<16x1xf32> to vector<16x16xf32>
    %27 = arith.subf %23, %26 : vector<16x16xf32>
    %28 = math.exp %27 : vector<16x16xf32>
    %cst_14 = arith.constant dense<0.000000e+00> : vector<16xf32>
    %29 = vector.multi_reduction <add>, %28, %cst_14 [1] : vector<16x16xf32> to vector<16xf32>
    %30 = vector.shape_cast %29 : vector<16xf32> to vector<16x1xf32>
    %31 = arith.truncf %28 : vector<16x16xf32> to vector<16x16xbf16>
    %c0_15 = arith.constant 0 : index
    %c0_16 = arith.constant 0 : index
    %32 = vector.load %arg16[%c0_15, %c0_16] : memref<16x32xbf16, #tpu.memory_space<vmem>>, vector<16x8xbf16>
    %cst_17 = arith.constant dense<0.000000e+00> : vector<16x8xf32>
    %33 = tpu.matmul %31, %32, %cst_17 {dimension_numbers = #tpu.dot_dimension_numbers<[1], [0], [0], [1], [0, 0, 1, 1], [], []>} : vector<16x16xbf16>, vector<16x8xbf16>, vector<16x8xf32> -> vector<16x8xf32>
    %34 = tpu.reciprocal %30 {approx = true} : vector<16x1xf32> -> vector<16x1xf32>
    %35 = vector.broadcast %34 : vector<16x1xf32> to vector<16x8xf32>
    %36 = arith.mulf %33, %35 : vector<16x8xf32>
    %37 = arith.truncf %36 : vector<16x8xf32> to vector<16x8xbf16>
    %c0_18 = arith.constant 0 : index
    %c0_19 = arith.constant 0 : index
    %38 = vector.load %arg17[%c0_18, %c0_19] : memref<16x32xbf16, #tpu.memory_space<vmem>>, vector<16x8xbf16>
    tpu.vector_store %arg17[%c0_18, %c0_19], %37 {strides = array<i32>} : memref<16x32xbf16, #tpu.memory_space<vmem>>, vector<16x8xbf16>,
    %39 = vector.extract_strided_slice %16 {offsets = [0, 8], sizes = [16, 8], strides = [1, 1]} : vector<16x32xbf16> to vector<16x8xbf16>
    %c8 = arith.constant 8 : index
    %c0_20 = arith.constant 0 : index
    %40 = vector.load %arg15[%c8, %c0_20] : memref<32x16xbf16, #tpu.memory_space<vmem>>, vector<8x16xbf16>
    %cst_21 = arith.constant dense<0.000000e+00> : vector<16x16xf32>
    %41 = tpu.matmul %39, %40, %cst_21 {dimension_numbers = #tpu.dot_dimension_numbers<[1], [0], [0], [1], [0, 0, 1, 1], [], []>} : vector<16x8xbf16>, vector<8x16xbf16>, vector<16x16xf32> -> vector<16x16xf32>
    %42 = vector.broadcast %18 : vector<1x16xf32> to vector<16x16xf32>
    %43 = arith.addf %41, %42 : vector<16x16xf32>
    %cst_22 = arith.constant dense<0xFF800000> : vector<16xf32>
    %44 = vector.multi_reduction <maximumf>, %43, %cst_22 [1] : vector<16x16xf32> to vector<16xf32>
    %45 = vector.shape_cast %44 : vector<16xf32> to vector<16x1xf32>
    %46 = vector.broadcast %45 : vector<16x1xf32> to vector<16x16xf32>
    %47 = arith.subf %43, %46 : vector<16x16xf32>
    %48 = math.exp %47 : vector<16x16xf32>
    %cst_23 = arith.constant dense<0.000000e+00> : vector<16xf32>
    %49 = vector.multi_reduction <add>, %48, %cst_23 [1] : vector<16x16xf32> to vector<16xf32>
    %50 = vector.shape_cast %49 : vector<16xf32> to vector<16x1xf32>
    %51 = arith.truncf %48 : vector<16x16xf32> to vector<16x16xbf16>
    %c0_24 = arith.constant 0 : index
    %c8_25 = arith.constant 8 : index
    %52 = vector.load %arg16[%c0_24, %c8_25] : memref<16x32xbf16, #tpu.memory_space<vmem>>, vector<16x8xbf16>
    %cst_26 = arith.constant dense<0.000000e+00> : vector<16x8xf32>
    %53 = tpu.matmul %51, %52, %cst_26 {dimension_numbers = #tpu.dot_dimension_numbers<[1], [0], [0], [1], [0, 0, 1, 1], [], []>} : vector<16x16xbf16>, vector<16x8xbf16>, vector<16x8xf32> -> vector<16x8xf32>
    %54 = tpu.reciprocal %50 {approx = true} : vector<16x1xf32> -> vector<16x1xf32>
    %55 = vector.broadcast %54 : vector<16x1xf32> to vector<16x8xf32>
    %56 = arith.mulf %53, %55 : vector<16x8xf32>
    %57 = arith.truncf %56 : vector<16x8xf32> to vector<16x8xbf16>
    %c0_27 = arith.constant 0 : index
    %c8_28 = arith.constant 8 : index
    %58 = vector.load %arg17[%c0_27, %c8_28] : memref<16x32xbf16, #tpu.memory_space<vmem>>, vector<16x8xbf16>
    tpu.vector_store %arg17[%c0_27, %c8_28], %57 {strides = array<i32>} : memref<16x32xbf16, #tpu.memory_space<vmem>>, vector<16x8xbf16>,
    %59 = vector.extract_strided_slice %16 {offsets = [0, 16], sizes = [16, 8], strides = [1, 1]} : vector<16x32xbf16> to vector<16x8xbf16>
    %c16 = arith.constant 16 : index
    %c0_29 = arith.constant 0 : index
    %60 = vector.load %arg15[%c16, %c0_29] : memref<32x16xbf16, #tpu.memory_space<vmem>>, vector<8x16xbf16>
    %cst_30 = arith.constant dense<0.000000e+00> : vector<16x16xf32>
    %61 = tpu.matmul %59, %60, %cst_30 {dimension_numbers = #tpu.dot_dimension_numbers<[1], [0], [0], [1], [0, 0, 1, 1], [], []>} : vector<16x8xbf16>, vector<8x16xbf16>, vector<16x16xf32> -> vector<16x16xf32>
    %62 = vector.broadcast %18 : vector<1x16xf32> to vector<16x16xf32>
    %63 = arith.addf %61, %62 : vector<16x16xf32>
    %cst_31 = arith.constant dense<0xFF800000> : vector<16xf32>
    %64 = vector.multi_reduction <maximumf>, %63, %cst_31 [1] : vector<16x16xf32> to vector<16xf32>
    %65 = vector.shape_cast %64 : vector<16xf32> to vector<16x1xf32>
    %66 = vector.broadcast %65 : vector<16x1xf32> to vector<16x16xf32>
    %67 = arith.subf %63, %66 : vector<16x16xf32>
    %68 = math.exp %67 : vector<16x16xf32>
    %cst_32 = arith.constant dense<0.000000e+00> : vector<16xf32>
    %69 = vector.multi_reduction <add>, %68, %cst_32 [1] : vector<16x16xf32> to vector<16xf32>
    %70 = vector.shape_cast %69 : vector<16xf32> to vector<16x1xf32>
    %71 = arith.truncf %68 : vector<16x16xf32> to vector<16x16xbf16>
    %c0_33 = arith.constant 0 : index
    %c16_34 = arith.constant 16 : index
    %72 = vector.load %arg16[%c0_33, %c16_34] : memref<16x32xbf16, #tpu.memory_space<vmem>>, vector<16x8xbf16>
    %cst_35 = arith.constant dense<0.000000e+00> : vector<16x8xf32>
    %73 = tpu.matmul %71, %72, %cst_35 {dimension_numbers = #tpu.dot_dimension_numbers<[1], [0], [0], [1], [0, 0, 1, 1], [], []>} : vector<16x16xbf16>, vector<16x8xbf16>, vector<16x8xf32> -> vector<16x8xf32>
    %74 = tpu.reciprocal %70 {approx = true} : vector<16x1xf32> -> vector<16x1xf32>
    %75 = vector.broadcast %74 : vector<16x1xf32> to vector<16x8xf32>
    %76 = arith.mulf %73, %75 : vector<16x8xf32>
    %77 = arith.truncf %76 : vector<16x8xf32> to vector<16x8xbf16>
    %c0_36 = arith.constant 0 : index
    %c16_37 = arith.constant 16 : index
    %78 = vector.load %arg17[%c0_36, %c16_37] : memref<16x32xbf16, #tpu.memory_space<vmem>>, vector<16x8xbf16>
    tpu.vector_store %arg17[%c0_36, %c16_37], %77 {strides = array<i32>} : memref<16x32xbf16, #tpu.memory_space<vmem>>, vector<16x8xbf16>,
    %79 = vector.extract_strided_slice %16 {offsets = [0, 24], sizes = [16, 8], strides = [1, 1]} : vector<16x32xbf16> to vector<16x8xbf16>
    %c24 = arith.constant 24 : index
    %c0_38 = arith.constant 0 : index
    %80 = vector.load %arg15[%c24, %c0_38] : memref<32x16xbf16, #tpu.memory_space<vmem>>, vector<8x16xbf16>
    %cst_39 = arith.constant dense<0.000000e+00> : vector<16x16xf32>
    %81 = tpu.matmul %79, %80, %cst_39 {dimension_numbers = #tpu.dot_dimension_numbers<[1], [0], [0], [1], [0, 0, 1, 1], [], []>} : vector<16x8xbf16>, vector<8x16xbf16>, vector<16x16xf32> -> vector<16x16xf32>
    %82 = vector.broadcast %18 : vector<1x16xf32> to vector<16x16xf32>
    %83 = arith.addf %81, %82 : vector<16x16xf32>
    %cst_40 = arith.constant dense<0xFF800000> : vector<16xf32>
    %84 = vector.multi_reduction <maximumf>, %83, %cst_40 [1] : vector<16x16xf32> to vector<16xf32>
    %85 = vector.shape_cast %84 : vector<16xf32> to vector<16x1xf32>
    %86 = vector.broadcast %85 : vector<16x1xf32> to vector<16x16xf32>
    %87 = arith.subf %83, %86 : vector<16x16xf32>
    %88 = math.exp %87 : vector<16x16xf32>
    %cst_41 = arith.constant dense<0.000000e+00> : vector<16xf32>
    %89 = vector.multi_reduction <add>, %88, %cst_41 [1] : vector<16x16xf32> to vector<16xf32>
    %90 = vector.shape_cast %89 : vector<16xf32> to vector<16x1xf32>
    %91 = arith.truncf %88 : vector<16x16xf32> to vector<16x16xbf16>
    %c0_42 = arith.constant 0 : index
    %c24_43 = arith.constant 24 : index
    %92 = vector.load %arg16[%c0_42, %c24_43] : memref<16x32xbf16, #tpu.memory_space<vmem>>, vector<16x8xbf16>
    %cst_44 = arith.constant dense<0.000000e+00> : vector<16x8xf32>
    %93 = tpu.matmul %91, %92, %cst_44 {dimension_numbers = #tpu.dot_dimension_numbers<[1], [0], [0], [1], [0, 0, 1, 1], [], []>} : vector<16x16xbf16>, vector<16x8xbf16>, vector<16x8xf32> -> vector<16x8xf32>
    %94 = tpu.reciprocal %90 {approx = true} : vector<16x1xf32> -> vector<16x1xf32>
    %95 = vector.broadcast %94 : vector<16x1xf32> to vector<16x8xf32>
    %96 = arith.mulf %93, %95 : vector<16x8xf32>
    %97 = arith.truncf %96 : vector<16x8xf32> to vector<16x8xbf16>
    %c0_45 = arith.constant 0 : index
    %c24_46 = arith.constant 24 : index
    %98 = vector.load %arg17[%c0_45, %c24_46] : memref<16x32xbf16, #tpu.memory_space<vmem>>, vector<16x8xbf16>
    tpu.vector_store %arg17[%c0_45, %c24_46], %97 {strides = array<i32>} : memref<16x32xbf16, #tpu.memory_space<vmem>>, vector<16x8xbf16>,
    %c0_47 = arith.constant 0 : index
    %c0_48 = arith.constant 0 : index
    %99 = vector.load %arg17[%c0_47, %c0_48] : memref<16x32xbf16, #tpu.memory_space<vmem>>, vector<16x32xbf16>
    %c0_49 = arith.constant 0 : index
    %c0_50 = arith.constant 0 : index
    %100 = vector.load %arg7[%c0_49, %c0_50] : memref<32x32xbf16, #tpu.memory_space<vmem>>, vector<32x32xbf16>
    %cst_51 = arith.constant dense<0.000000e+00> : vector<16x32xf32>
    %101 = tpu.matmul %99, %100, %cst_51 {dimension_numbers = #tpu.dot_dimension_numbers<[1], [0], [0], [1], [0, 0, 1, 1], [], []>} : vector<16x32xbf16>, vector<32x32xbf16>, vector<16x32xf32> -> vector<16x32xf32>
    %c0_52 = arith.constant 0 : index
    %c0_53 = arith.constant 0 : index
    %102 = vector.load %arg11[%c0_52, %c0_53] : memref<1x32xf32, #tpu.memory_space<vmem>>, vector<1x32xf32>
    %103 = vector.broadcast %102 : vector<1x32xf32> to vector<16x32xf32>
    %104 = arith.addf %101, %103 : vector<16x32xf32>
    %105 = arith.addf %104, %7 : vector<16x32xf32>
    %c0_54 = arith.constant 0 : index
    %c0_55 = arith.constant 0 : index
    %106 = vector.load %arg12[%c0_54, %c0_55] : memref<1x32xf32, #tpu.memory_space<vmem>>, vector<1x32xf32>
    %c0_56 = arith.constant 0 : index
    %c0_57 = arith.constant 0 : index
    %107 = vector.load %arg13[%c0_56, %c0_57] : memref<1x32xf32, #tpu.memory_space<vmem>>, vector<1x32xf32>
    %cst_58 = arith.constant dense<0.000000e+00> : vector<16xf32>
    %108 = vector.multi_reduction <add>, %105, %cst_58 [1] : vector<16x32xf32> to vector<16xf32>
    %109 = vector.shape_cast %108 : vector<16xf32> to vector<16x1xf32>
    %cst_59 = arith.constant 3.200000e+01 : f32
    %110 = vector.broadcast %cst_59 : f32 to vector<16x1xf32>
    %111 = arith.divf %109, %110 : vector<16x1xf32>
    %112 = vector.broadcast %111 : vector<16x1xf32> to vector<16x32xf32>
    %113 = arith.subf %105, %112 : vector<16x32xf32>
    %114 = arith.mulf %113, %113 : vector<16x32xf32>
    %cst_60 = arith.constant dense<0.000000e+00> : vector<16xf32>
    %115 = vector.multi_reduction <add>, %114, %cst_60 [1] : vector<16x32xf32> to vector<16xf32>
    %116 = vector.shape_cast %115 : vector<16xf32> to vector<16x1xf32>
    %cst_61 = arith.constant 3.200000e+01 : f32
    %117 = vector.broadcast %cst_61 : f32 to vector<16x1xf32>
    %118 = arith.divf %116, %117 : vector<16x1xf32>
    %119 = vector.broadcast %111 : vector<16x1xf32> to vector<16x32xf32>
    %120 = arith.subf %105, %119 : vector<16x32xf32>
    %cst_62 = arith.constant 9.99999996E-13 : f32
    %121 = vector.broadcast %cst_62 : f32 to vector<16x1xf32>
    %122 = arith.addf %118, %121 : vector<16x1xf32>
    %123 = math.rsqrt %122 : vector<16x1xf32>
    %124 = vector.broadcast %106 : vector<1x32xf32> to vector<16x32xf32>
    %125 = vector.broadcast %123 : vector<16x1xf32> to vector<16x32xf32>
    %126 = arith.mulf %124, %125 : vector<16x32xf32>
    %127 = arith.mulf %120, %126 : vector<16x32xf32>
    %128 = vector.broadcast %107 : vector<1x32xf32> to vector<16x32xf32>
    %129 = arith.addf %127, %128 : vector<16x32xf32>
    %c0_63 = arith.constant 0 : index
    %c0_64 = arith.constant 0 : index
    %c0_65 = arith.constant 0 : index
    %130 = vector.load %arg14[%c0_63, %c0_64, %c0_65] : memref<1x16x32xf32, #tpu.memory_space<vmem>>, vector<1x16x32xf32>
    %131 = vector.shape_cast %130 : vector<1x16x32xf32> to vector<16x32xf32>
    %132 = vector.shape_cast %129 : vector<16x32xf32> to vector<1x16x32xf32>
    tpu.vector_store %arg14[%c0_63, %c0_64, %c0_65], %132 {strides = array<i32>} : memref<1x16x32xf32, #tpu.memory_space<vmem>>, vector<1x16x32xf32>,
    return
  }
  func.func @transform_0(%arg0: i32, %arg1: i32) -> (i32, i32, i32) {
    %c0_i32 = arith.constant 0 : i32
    %c0_i32_0 = arith.constant 0 : i32
    %c0_i32_1 = arith.constant 0 : i32
    return %arg0, %c0_i32, %c0_i32_0 : i32, i32, i32
  }
  func.func @transform_1(%arg0: i32, %arg1: i32) -> (i32, i32, i32) {
    %c0_i32 = arith.constant 0 : i32
    %c0_i32_0 = arith.constant 0 : i32
    %c0_i32_1 = arith.constant 0 : i32
    return %arg0, %c0_i32, %c0_i32_0 : i32, i32, i32
  }
  func.func @transform_2(%arg0: i32, %arg1: i32) -> (i32, i32) {
    %c0_i32 = arith.constant 0 : i32
    %c0_i32_0 = arith.constant 0 : i32
    %c0_i32_1 = arith.constant 0 : i32
    return %c0_i32, %c0_i32_0 : i32, i32
  }
  func.func @transform_3(%arg0: i32, %arg1: i32) -> (i32, i32) {
    %c0_i32 = arith.constant 0 : i32
    %c0_i32_0 = arith.constant 0 : i32
    %c0_i32_1 = arith.constant 0 : i32
    return %c0_i32, %c0_i32_0 : i32, i32
  }
  func.func @transform_4(%arg0: i32, %arg1: i32) -> (i32, i32) {
    %c0_i32 = arith.constant 0 : i32
    %c0_i32_0 = arith.constant 0 : i32
    %c0_i32_1 = arith.constant 0 : i32
    return %c0_i32, %c0_i32_0 : i32, i32
  }
  func.func @transform_5(%arg0: i32, %arg1: i32) -> (i32, i32) {
    %c0_i32 = arith.constant 0 : i32
    %c0_i32_0 = arith.constant 0 : i32
    %c0_i32_1 = arith.constant 0 : i32
    return %c0_i32, %c0_i32_0 : i32, i32
  }
  func.func @transform_6(%arg0: i32, %arg1: i32) -> (i32, i32) {
    %c0_i32 = arith.constant 0 : i32
    %c0_i32_0 = arith.constant 0 : i32
    %c0_i32_1 = arith.constant 0 : i32
    return %c0_i32, %c0_i32_0 : i32, i32
  }
  func.func @transform_7(%arg0: i32, %arg1: i32) -> (i32, i32) {
    %c0_i32 = arith.constant 0 : i32
    %c0_i32_0 = arith.constant 0 : i32
    %c0_i32_1 = arith.constant 0 : i32
    return %c0_i32, %c0_i32_0 : i32, i32
  }
  func.func @transform_8(%arg0: i32, %arg1: i32) -> (i32, i32) {
    %c0_i32 = arith.constant 0 : i32
    %c0_i32_0 = arith.constant 0 : i32
    %c0_i32_1 = arith.constant 0 : i32
    return %c0_i32, %c0_i32_0 : i32, i32
  }
  func.func @transform_9(%arg0: i32, %arg1: i32) -> (i32, i32) {
    %c0_i32 = arith.constant 0 : i32
    %c0_i32_0 = arith.constant 0 : i32
    %c0_i32_1 = arith.constant 0 : i32
    return %c0_i32, %c0_i32_0 : i32, i32
  }
  func.func @transform_10(%arg0: i32, %arg1: i32) -> (i32, i32) {
    %c0_i32 = arith.constant 0 : i32
    %c0_i32_0 = arith.constant 0 : i32
    %c0_i32_1 = arith.constant 0 : i32
    return %c0_i32, %c0_i32_0 : i32, i32
  }
  func.func @transform_11(%arg0: i32, %arg1: i32) -> (i32, i32) {
    %c0_i32 = arith.constant 0 : i32
    %c0_i32_0 = arith.constant 0 : i32
    %c0_i32_1 = arith.constant 0 : i32
    return %c0_i32, %c0_i32_0 : i32, i32
  }
  func.func @transform_12(%arg0: i32, %arg1: i32) -> (i32, i32, i32) {
    %c0_i32 = arith.constant 0 : i32
    %c0_i32_0 = arith.constant 0 : i32
    return %arg0, %arg1, %c0_i32 : i32, i32, i32
  }
}

module attributes {stable_mosaic.version = 11 : i64} {
  func.func @splinter_attention_kernel(%arg0: i32, %arg1: i32, %arg2: memref<1x16x32xf32, #tpu.memory_space<vmem>>, %arg3: memref<1x1x16xf32, #tpu.memory_space<vmem>>, %arg4: memref<32x32xbf16, #tpu.memory_space<vmem>>, %arg5: memref<32x32xbf16, #tpu.memory_space<vmem>>, %arg6: memref<32x32xbf16, #tpu.memory_space<vmem>>, %arg7: memref<32x32xbf16, #tpu.memory_space<vmem>>, %arg8: memref<1x32xf32, #tpu.memory_space<vmem>>, %arg9: memref<1x32xf32, #tpu.memory_space<vmem>>, %arg10: memref<1x32xf32, #tpu.memory_space<vmem>>, %arg11: memref<1x32xf32, #tpu.memory_space<vmem>>, %arg12: memref<1x32xf32, #tpu.memory_space<vmem>>, %arg13: memref<1x32xf32, #tpu.memory_space<vmem>>, %arg14: memref<1x16x32xf32, #tpu.memory_space<vmem>>, %arg15: memref<32x16xbf16, #tpu.memory_space<vmem>>, %arg16: memref<16x32xbf16, #tpu.memory_space<vmem>>, %arg17: memref<16x32xbf16, #tpu.memory_space<vmem>>) attributes {dimension_semantics = [#tpu.dimension_semantics<parallel>, #tpu.dimension_semantics<arbitrary>], iteration_bounds = array<i64: 2, 1>, scalar_prefetch = 0 : i64, scratch_operands = 3 : i64, tpu.core_type = #tpu.core_type<tc>, window_params = [{transform_indices = @transform_0, window_bounds = array<i64: 1, 16, 32>}, {transform_indices = @transform_1, window_bounds = array<i64: 1, 1, 16>}, {pipeline_mode = #tpu.pipeline_mode<synchronous>, transform_indices = @transform_2, window_bounds = array<i64: 32, 32>}, {pipeline_mode = #tpu.pipeline_mode<synchronous>, transform_indices = @transform_3, window_bounds = array<i64: 32, 32>}, {pipeline_mode = #tpu.pipeline_mode<synchronous>, transform_indices = @transform_4, window_bounds = array<i64: 32, 32>}, {pipeline_mode = #tpu.pipeline_mode<synchronous>, transform_indices = @transform_5, window_bounds = array<i64: 32, 32>}, {pipeline_mode = #tpu.pipeline_mode<synchronous>, transform_indices = @transform_6, window_bounds = array<i64: 1, 32>}, {pipeline_mode = #tpu.pipeline_mode<synchronous>, transform_indices = @transform_7, window_bounds = array<i64: 1, 32>}, {pipeline_mode = #tpu.pipeline_mode<synchronous>, transform_indices = @transform_8, window_bounds = array<i64: 1, 32>}, {pipeline_mode = #tpu.pipeline_mode<synchronous>, transform_indices = @transform_9, window_bounds = array<i64: 1, 32>}, {pipeline_mode = #tpu.pipeline_mode<synchronous>, transform_indices = @transform_10, window_bounds = array<i64: 1, 32>}, {pipeline_mode = #tpu.pipeline_mode<synchronous>, transform_indices = @transform_11, window_bounds = array<i64: 1, 32>}, {transform_indices = @transform_12, window_bounds = array<i64: 1, 16, 32>}]} {
    %c0_i32 = arith.constant 0 : i32
    %0 = arith.cmpi eq, %arg1, %c0_i32 : i32
    %1 = arith.extui %0 : i1 to i32
    %c0_i32_0 = arith.constant 0 : i32
    %2 = arith.cmpi ne, %1, %c0_i32_0 : i32
    scf.if %2 {
      %c0_66 = arith.constant 0 : index
      %c0_67 = arith.constant 0 : index
      %c0_68 = arith.constant 0 : index
      %133 = vector.load %arg2[%c0_66, %c0_67, %c0_68] : memref<1x16x32xf32, #tpu.memory_space<vmem>>, vector<1x16x32xf32>
      %134 = vector.shape_cast %133 : vector<1x16x32xf32> to vector<16x32xf32>
      %135 = arith.truncf %134 : vector<16x32xf32> to vector<16x32xbf16>
      %c0_69 = arith.constant 0 : index
      %c0_70 = arith.constant 0 : index
      %136 = vector.load %arg5[%c0_69, %c0_70] : memref<32x32xbf16, #tpu.memory_space<vmem>>, vector<32x32xbf16>
      %cst_71 = arith.constant dense<0.000000e+00> : vector<16x32xf32>
      %137 = tpu.matmul %135, %136, %cst_71 {dimension_numbers = #tpu.dot_dimension_numbers<[1], [0], [0], [1], [0, 0, 1, 1], [], []>} : vector<16x32xbf16>, vector<32x32xbf16>, vector<16x32xf32> -> vector<16x32xf32>
      %c0_72 = arith.constant 0 : index
      %c0_73 = arith.constant 0 : index
      %138 = vector.load %arg9[%c0_72, %c0_73] : memref<1x32xf32, #tpu.memory_space<vmem>>, vector<1x32xf32>
      %139 = vector.broadcast %138 : vector<1x32xf32> to vector<16x32xf32>
      %140 = arith.addf %137, %139 : vector<16x32xf32>
      %c0_74 = arith.constant 0 : index
      %c0_75 = arith.constant 0 : index
      %141 = vector.load %arg6[%c0_74, %c0_75] : memref<32x32xbf16, #tpu.memory_space<vmem>>, vector<32x32xbf16>
      %cst_76 = arith.constant dense<0.000000e+00> : vector<16x32xf32>
      %142 = tpu.matmul %135, %141, %cst_76 {dimension_numbers = #tpu.dot_dimension_numbers<[1], [0], [0], [1], [0, 0, 1, 1], [], []>} : vector<16x32xbf16>, vector<32x32xbf16>, vector<16x32xf32> -> vector<16x32xf32>
      %c0_77 = arith.constant 0 : index
      %c0_78 = arith.constant 0 : index
      %143 = vector.load %arg10[%c0_77, %c0_78] : memref<1x32xf32, #tpu.memory_space<vmem>>, vector<1x32xf32>
      %144 = vector.broadcast %143 : vector<1x32xf32> to vector<16x32xf32>
      %145 = arith.addf %142, %144 : vector<16x32xf32>
      %146 = tpu.transpose %140, [1, 0] : vector<16x32xf32> -> vector<32x16xf32>
      %147 = arith.truncf %146 : vector<32x16xf32> to vector<32x16xbf16>
      %c0_79 = arith.constant 0 : index
      %c0_80 = arith.constant 0 : index
      %148 = vector.load %arg15[%c0_79, %c0_80] : memref<32x16xbf16, #tpu.memory_space<vmem>>, vector<32x16xbf16>
      tpu.vector_store %arg15[%c0_79, %c0_80], %147 {strides = array<i32>} : memref<32x16xbf16, #tpu.memory_space<vmem>>, vector<32x16xbf16>,
      %149 = arith.truncf %145 : vector<16x32xf32> to vector<16x32xbf16>
      %c0_81 = arith.constant 0 : index
      %c0_82 = arith.constant 0 : index
      %150 = vector.load %arg16[%c0_81, %c0_82] : memref<16x32xbf16, #tpu.memory_space<vmem>>, vector<16x32xbf16>
      tpu.vector_store %arg16[%c0_81, %c0_82], %149 {strides = array<i32>} : memref<16x32xbf16, #tpu.memory_space<vmem>>, vector<16x32xbf16>,
    } else {
    }
    %c16_i32 = arith.constant 16 : i32
    %3 = arith.muli %arg1, %c16_i32 : i32
    %4 = tpu.assume_multiple %3, 8 : i32
    %c0 = arith.constant 0 : index
    %5 = arith.index_cast %4 : i32 to index
    %c0_1 = arith.constant 0 : index
    %6 = vector.load %arg2[%c0, %5, %c0_1] : memref<1x16x32xf32, #tpu.memory_space<vmem>>, vector<1x16x32xf32>
    %7 = vector.shape_cast %6 : vector<1x16x32xf32> to vector<16x32xf32>
    %8 = arith.truncf %7 : vector<16x32xf32> to vector<16x32xbf16>
    %c0_2 = arith.constant 0 : index
    %c0_3 = arith.constant 0 : index
    %9 = vector.load %arg4[%c0_2, %c0_3] : memref<32x32xbf16, #tpu.memory_space<vmem>>, vector<32x32xbf16>
    %cst = arith.constant dense<0.000000e+00> : vector<16x32xf32>
    %10 = tpu.matmul %8, %9, %cst {dimension_numbers = #tpu.dot_dimension_numbers<[1], [0], [0], [1], [0, 0, 1, 1], [], []>} : vector<16x32xbf16>, vector<32x32xbf16>, vector<16x32xf32> -> vector<16x32xf32>
    %c0_4 = arith.constant 0 : index
    %c0_5 = arith.constant 0 : index
    %11 = vector.load %arg8[%c0_4, %c0_5] : memref<1x32xf32, #tpu.memory_space<vmem>>, vector<1x32xf32>
    %12 = vector.broadcast %11 : vector<1x32xf32> to vector<16x32xf32>
    %13 = arith.addf %10, %12 : vector<16x32xf32>
    %cst_6 = arith.constant 0.353553385 : f32
    %14 = vector.broadcast %cst_6 : f32 to vector<16x32xf32>
    %15 = arith.mulf %13, %14 : vector<16x32xf32>
    %16 = arith.truncf %15 : vector<16x32xf32> to vector<16x32xbf16>
    %c0_7 = arith.constant 0 : index
    %c0_8 = arith.constant 0 : index
    %c0_9 = arith.constant 0 : index
    %17 = vector.load %arg3[%c0_7, %c0_8, %c0_9] : memref<1x1x16xf32, #tpu.memory_space<vmem>>, vector<1x1x16xf32>
    %18 = vector.shape_cast %17 : vector<1x1x16xf32> to vector<1x16xf32>
    %19 = vector.extract_strided_slice %16 {offsets = [0, 0], sizes = [16, 8], strides = [1, 1]} : vector<16x32xbf16> to vector<16x8xbf16>
    %c0_10 = arith.constant 0 : index
    %c0_11 = arith.constant 0 : index
    %20 = vector.load %arg15[%c0_10, %c0_11] : memref<32x16xbf16, #tpu.memory_space<vmem>>, vector<8x16xbf16>
    %cst_12 = arith.constant dense<0.000000e+00> : vector<16x16xf32>
    %21 = tpu.matmul %19, %20, %cst_12 {dimension_numbers = #tpu.dot_dimension_numbers<[1], [0], [0], [1], [0, 0, 1, 1], [], []>} : vector<16x8xbf16>, vector<8x16xbf16>, vector<16x16xf32> -> vector<16x16xf32>
    %22 = vector.broadcast %18 : vector<1x16xf32> to vector<16x16xf32>
    %23 = arith.addf %21, %22 : vector<16x16xf32>
    %cst_13 = arith.constant dense<0xFF800000> : vector<16xf32>
    %24 = vector.multi_reduction <maximumf>, %23, %cst_13 [1] : vector<16x16xf32> to vector<16xf32>
    %25 = vector.shape_cast %24 : vector<16xf32> to vector<16x1xf32>
    %26 = vector.broadcast %25 : vector<16x1xf32> to vector<16x16xf32>
    %27 = arith.subf %23, %26 : vector<16x16xf32>
    %28 = math.exp %27 : vector<16x16xf32>
    %cst_14 = arith.constant dense<0.000000e+00> : vector<16xf32>
    %29 = vector.multi_reduction <add>, %28, %cst_14 [1] : vector<16x16xf32> to vector<16xf32>
    %30 = vector.shape_cast %29 : vector<16xf32> to vector<16x1xf32>
    %31 = arith.truncf %28 : vector<16x16xf32> to vector<16x16xbf16>
    %c0_15 = arith.constant 0 : index
    %c0_16 = arith.constant 0 : index
    %32 = vector.load %arg16[%c0_15, %c0_16] : memref<16x32xbf16, #tpu.memory_space<vmem>>, vector<16x8xbf16>
    %cst_17 = arith.constant dense<0.000000e+00> : vector<16x8xf32>
    %33 = tpu.matmul %31, %32, %cst_17 {dimension_numbers = #tpu.dot_dimension_numbers<[1], [0], [0], [1], [0, 0, 1, 1], [], []>} : vector<16x16xbf16>, vector<16x8xbf16>, vector<16x8xf32> -> vector<16x8xf32>
    %34 = tpu.reciprocal %30 {approx = true} : vector<16x1xf32> -> vector<16x1xf32>
    %35 = vector.broadcast %34 : vector<16x1xf32> to vector<16x8xf32>
    %36 = arith.mulf %33, %35 : vector<16x8xf32>
    %37 = arith.truncf %36 : vector<16x8xf32> to vector<16x8xbf16>
    %c0_18 = arith.constant 0 : index
    %c0_19 = arith.constant 0 : index
    %38 = vector.load %arg17[%c0_18, %c0_19] : memref<16x32xbf16, #tpu.memory_space<vmem>>, vector<16x8xbf16>
    tpu.vector_store %arg17[%c0_18, %c0_19], %37 {strides = array<i32>} : memref<16x32xbf16, #tpu.memory_space<vmem>>, vector<16x8xbf16>,
    %39 = vector.extract_strided_slice %16 {offsets = [0, 8], sizes = [16, 8], strides = [1, 1]} : vector<16x32xbf16> to vector<16x8xbf16>
    %c8 = arith.constant 8 : index
    %c0_20 = arith.constant 0 : index
    %40 = vector.load %arg15[%c8, %c0_20] : memref<32x16xbf16, #tpu.memory_space<vmem>>, vector<8x16xbf16>
    %cst_21 = arith.constant dense<0.000000e+00> : vector<16x16xf32>
    %41 = tpu.matmul %39, %40, %cst_21 {dimension_numbers = #tpu.dot_dimension_numbers<[1], [0], [0], [1], [0, 0, 1, 1], [], []>} : vector<16x8xbf16>, vector<8x16xbf16>, vector<16x16xf32> -> vector<16x16xf32>
    %42 = vector.broadcast %18 : vector<1x16xf32> to vector<16x16xf32>
    %43 = arith.addf %41, %42 : vector<16x16xf32>
    %cst_22 = arith.constant dense<0xFF800000> : vector<16xf32>
    %44 = vector.multi_reduction <maximumf>, %43, %cst_22 [1] : vector<16x16xf32> to vector<16xf32>
    %45 = vector.shape_cast %44 : vector<16xf32> to vector<16x1xf32>
    %46 = vector.broadcast %45 : vector<16x1xf32> to vector<16x16xf32>
    %47 = arith.subf %43, %46 : vector<16x16xf32>
    %48 = math.exp %47 : vector<16x16xf32>
    %cst_23 = arith.constant dense<0.000000e+00> : vector<16xf32>
    %49 = vector.multi_reduction <add>, %48, %cst_23 [1] : vector<16x16xf32> to vector<16xf32>
    %50 = vector.shape_cast %49 : vector<16xf32> to vector<16x1xf32>
    %51 = arith.truncf %48 : vector<16x16xf32> to vector<16x16xbf16>
    %c0_24 = arith.constant 0 : index
    %c8_25 = arith.constant 8 : index
    %52 = vector.load %arg16[%c0_24, %c8_25] : memref<16x32xbf16, #tpu.memory_space<vmem>>, vector<16x8xbf16>
    %cst_26 = arith.constant dense<0.000000e+00> : vector<16x8xf32>
    %53 = tpu.matmul %51, %52, %cst_26 {dimension_numbers = #tpu.dot_dimension_numbers<[1], [0], [0], [1], [0, 0, 1, 1], [], []>} : vector<16x16xbf16>, vector<16x8xbf16>, vector<16x8xf32> -> vector<16x8xf32>
    %54 = tpu.reciprocal %50 {approx = true} : vector<16x1xf32> -> vector<16x1xf32>
    %55 = vector.broadcast %54 : vector<16x1xf32> to vector<16x8xf32>
    %56 = arith.mulf %53, %55 : vector<16x8xf32>
    %57 = arith.truncf %56 : vector<16x8xf32> to vector<16x8xbf16>
    %c0_27 = arith.constant 0 : index
    %c8_28 = arith.constant 8 : index
    %58 = vector.load %arg17[%c0_27, %c8_28] : memref<16x32xbf16, #tpu.memory_space<vmem>>, vector<16x8xbf16>
    tpu.vector_store %arg17[%c0_27, %c8_28], %57 {strides = array<i32>} : memref<16x32xbf16, #tpu.memory_space<vmem>>, vector<16x8xbf16>,
    %59 = vector.extract_strided_slice %16 {offsets = [0, 16], sizes = [16, 8], strides = [1, 1]} : vector<16x32xbf16> to vector<16x8xbf16>
    %c16 = arith.constant 16 : index
    %c0_29 = arith.constant 0 : index
    %60 = vector.load %arg15[%c16, %c0_29] : memref<32x16xbf16, #tpu.memory_space<vmem>>, vector<8x16xbf16>
    %cst_30 = arith.constant dense<0.000000e+00> : vector<16x16xf32>
    %61 = tpu.matmul %59, %60, %cst_30 {dimension_numbers = #tpu.dot_dimension_numbers<[1], [0], [0], [1], [0, 0, 1, 1], [], []>} : vector<16x8xbf16>, vector<8x16xbf16>, vector<16x16xf32> -> vector<16x16xf32>
    %62 = vector.broadcast %18 : vector<1x16xf32> to vector<16x16xf32>
    %63 = arith.addf %61, %62 : vector<16x16xf32>
    %cst_31 = arith.constant dense<0xFF800000> : vector<16xf32>
    %64 = vector.multi_reduction <maximumf>, %63, %cst_31 [1] : vector<16x16xf32> to vector<16xf32>
    %65 = vector.shape_cast %64 : vector<16xf32> to vector<16x1xf32>
    %66 = vector.broadcast %65 : vector<16x1xf32> to vector<16x16xf32>
    %67 = arith.subf %63, %66 : vector<16x16xf32>
    %68 = math.exp %67 : vector<16x16xf32>
    %cst_32 = arith.constant dense<0.000000e+00> : vector<16xf32>
    %69 = vector.multi_reduction <add>, %68, %cst_32 [1] : vector<16x16xf32> to vector<16xf32>
    %70 = vector.shape_cast %69 : vector<16xf32> to vector<16x1xf32>
    %71 = arith.truncf %68 : vector<16x16xf32> to vector<16x16xbf16>
    %c0_33 = arith.constant 0 : index
    %c16_34 = arith.constant 16 : index
    %72 = vector.load %arg16[%c0_33, %c16_34] : memref<16x32xbf16, #tpu.memory_space<vmem>>, vector<16x8xbf16>
    %cst_35 = arith.constant dense<0.000000e+00> : vector<16x8xf32>
    %73 = tpu.matmul %71, %72, %cst_35 {dimension_numbers = #tpu.dot_dimension_numbers<[1], [0], [0], [1], [0, 0, 1, 1], [], []>} : vector<16x16xbf16>, vector<16x8xbf16>, vector<16x8xf32> -> vector<16x8xf32>
    %74 = tpu.reciprocal %70 {approx = true} : vector<16x1xf32> -> vector<16x1xf32>
    %75 = vector.broadcast %74 : vector<16x1xf32> to vector<16x8xf32>
    %76 = arith.mulf %73, %75 : vector<16x8xf32>
    %77 = arith.truncf %76 : vector<16x8xf32> to vector<16x8xbf16>
    %c0_36 = arith.constant 0 : index
    %c16_37 = arith.constant 16 : index
    %78 = vector.load %arg17[%c0_36, %c16_37] : memref<16x32xbf16, #tpu.memory_space<vmem>>, vector<16x8xbf16>
    tpu.vector_store %arg17[%c0_36, %c16_37], %77 {strides = array<i32>} : memref<16x32xbf16, #tpu.memory_space<vmem>>, vector<16x8xbf16>,
    %79 = vector.extract_strided_slice %16 {offsets = [0, 24], sizes = [16, 8], strides = [1, 1]} : vector<16x32xbf16> to vector<16x8xbf16>
    %c24 = arith.constant 24 : index
    %c0_38 = arith.constant 0 : index
    %80 = vector.load %arg15[%c24, %c0_38] : memref<32x16xbf16, #tpu.memory_space<vmem>>, vector<8x16xbf16>
    %cst_39 = arith.constant dense<0.000000e+00> : vector<16x16xf32>
    %81 = tpu.matmul %79, %80, %cst_39 {dimension_numbers = #tpu.dot_dimension_numbers<[1], [0], [0], [1], [0, 0, 1, 1], [], []>} : vector<16x8xbf16>, vector<8x16xbf16>, vector<16x16xf32> -> vector<16x16xf32>
    %82 = vector.broadcast %18 : vector<1x16xf32> to vector<16x16xf32>
    %83 = arith.addf %81, %82 : vector<16x16xf32>
    %cst_40 = arith.constant dense<0xFF800000> : vector<16xf32>
    %84 = vector.multi_reduction <maximumf>, %83, %cst_40 [1] : vector<16x16xf32> to vector<16xf32>
    %85 = vector.shape_cast %84 : vector<16xf32> to vector<16x1xf32>
    %86 = vector.broadcast %85 : vector<16x1xf32> to vector<16x16xf32>
    %87 = arith.subf %83, %86 : vector<16x16xf32>
    %88 = math.exp %87 : vector<16x16xf32>
    %cst_41 = arith.constant dense<0.000000e+00> : vector<16xf32>
    %89 = vector.multi_reduction <add>, %88, %cst_41 [1] : vector<16x16xf32> to vector<16xf32>
    %90 = vector.shape_cast %89 : vector<16xf32> to vector<16x1xf32>
    %91 = arith.truncf %88 : vector<16x16xf32> to vector<16x16xbf16>
    %c0_42 = arith.constant 0 : index
    %c24_43 = arith.constant 24 : index
    %92 = vector.load %arg16[%c0_42, %c24_43] : memref<16x32xbf16, #tpu.memory_space<vmem>>, vector<16x8xbf16>
    %cst_44 = arith.constant dense<0.000000e+00> : vector<16x8xf32>
    %93 = tpu.matmul %91, %92, %cst_44 {dimension_numbers = #tpu.dot_dimension_numbers<[1], [0], [0], [1], [0, 0, 1, 1], [], []>} : vector<16x16xbf16>, vector<16x8xbf16>, vector<16x8xf32> -> vector<16x8xf32>
    %94 = tpu.reciprocal %90 {approx = true} : vector<16x1xf32> -> vector<16x1xf32>
    %95 = vector.broadcast %94 : vector<16x1xf32> to vector<16x8xf32>
    %96 = arith.mulf %93, %95 : vector<16x8xf32>
    %97 = arith.truncf %96 : vector<16x8xf32> to vector<16x8xbf16>
    %c0_45 = arith.constant 0 : index
    %c24_46 = arith.constant 24 : index
    %98 = vector.load %arg17[%c0_45, %c24_46] : memref<16x32xbf16, #tpu.memory_space<vmem>>, vector<16x8xbf16>
    tpu.vector_store %arg17[%c0_45, %c24_46], %97 {strides = array<i32>} : memref<16x32xbf16, #tpu.memory_space<vmem>>, vector<16x8xbf16>,
    %c0_47 = arith.constant 0 : index
    %c0_48 = arith.constant 0 : index
    %99 = vector.load %arg17[%c0_47, %c0_48] : memref<16x32xbf16, #tpu.memory_space<vmem>>, vector<16x32xbf16>
    %c0_49 = arith.constant 0 : index
    %c0_50 = arith.constant 0 : index
    %100 = vector.load %arg7[%c0_49, %c0_50] : memref<32x32xbf16, #tpu.memory_space<vmem>>, vector<32x32xbf16>
    %cst_51 = arith.constant dense<0.000000e+00> : vector<16x32xf32>
    %101 = tpu.matmul %99, %100, %cst_51 {dimension_numbers = #tpu.dot_dimension_numbers<[1], [0], [0], [1], [0, 0, 1, 1], [], []>} : vector<16x32xbf16>, vector<32x32xbf16>, vector<16x32xf32> -> vector<16x32xf32>
    %c0_52 = arith.constant 0 : index
    %c0_53 = arith.constant 0 : index
    %102 = vector.load %arg11[%c0_52, %c0_53] : memref<1x32xf32, #tpu.memory_space<vmem>>, vector<1x32xf32>
    %103 = vector.broadcast %102 : vector<1x32xf32> to vector<16x32xf32>
    %104 = arith.addf %101, %103 : vector<16x32xf32>
    %105 = arith.addf %104, %7 : vector<16x32xf32>
    %c0_54 = arith.constant 0 : index
    %c0_55 = arith.constant 0 : index
    %106 = vector.load %arg12[%c0_54, %c0_55] : memref<1x32xf32, #tpu.memory_space<vmem>>, vector<1x32xf32>
    %c0_56 = arith.constant 0 : index
    %c0_57 = arith.constant 0 : index
    %107 = vector.load %arg13[%c0_56, %c0_57] : memref<1x32xf32, #tpu.memory_space<vmem>>, vector<1x32xf32>
    %cst_58 = arith.constant dense<0.000000e+00> : vector<16xf32>
    %108 = vector.multi_reduction <add>, %105, %cst_58 [1] : vector<16x32xf32> to vector<16xf32>
    %109 = vector.shape_cast %108 : vector<16xf32> to vector<16x1xf32>
    %cst_59 = arith.constant 3.200000e+01 : f32
    %110 = vector.broadcast %cst_59 : f32 to vector<16x1xf32>
    %111 = arith.divf %109, %110 : vector<16x1xf32>
    %112 = vector.broadcast %111 : vector<16x1xf32> to vector<16x32xf32>
    %113 = arith.subf %105, %112 : vector<16x32xf32>
    %114 = arith.mulf %113, %113 : vector<16x32xf32>
    %cst_60 = arith.constant dense<0.000000e+00> : vector<16xf32>
    %115 = vector.multi_reduction <add>, %114, %cst_60 [1] : vector<16x32xf32> to vector<16xf32>
    %116 = vector.shape_cast %115 : vector<16xf32> to vector<16x1xf32>
    %cst_61 = arith.constant 3.200000e+01 : f32
    %117 = vector.broadcast %cst_61 : f32 to vector<16x1xf32>
    %118 = arith.divf %116, %117 : vector<16x1xf32>
    %119 = vector.broadcast %111 : vector<16x1xf32> to vector<16x32xf32>
    %120 = arith.subf %105, %119 : vector<16x32xf32>
    %cst_62 = arith.constant 9.99999996E-13 : f32
    %121 = vector.broadcast %cst_62 : f32 to vector<16x1xf32>
    %122 = arith.addf %118, %121 : vector<16x1xf32>
    %123 = math.rsqrt %122 : vector<16x1xf32>
    %124 = vector.broadcast %106 : vector<1x32xf32> to vector<16x32xf32>
    %125 = vector.broadcast %123 : vector<16x1xf32> to vector<16x32xf32>
    %126 = arith.mulf %124, %125 : vector<16x32xf32>
    %127 = arith.mulf %120, %126 : vector<16x32xf32>
    %128 = vector.broadcast %107 : vector<1x32xf32> to vector<16x32xf32>
    %129 = arith.addf %127, %128 : vector<16x32xf32>
    %c0_63 = arith.constant 0 : index
    %c0_64 = arith.constant 0 : index
    %c0_65 = arith.constant 0 : index
    %130 = vector.load %arg14[%c0_63, %c0_64, %c0_65] : memref<1x16x32xf32, #tpu.memory_space<vmem>>, vector<1x16x32xf32>
    %131 = vector.shape_cast %130 : vector<1x16x32xf32> to vector<16x32xf32>
    %132 = vector.shape_cast %129 : vector<16x32xf32> to vector<1x16x32xf32>
    tpu.vector_store %arg14[%c0_63, %c0_64, %c0_65], %132 {strides = array<i32>} : memref<1x16x32xf32, #tpu.memory_space<vmem>>, vector<1x16x32xf32>,
    return
  }
  func.func @transform_0(%arg0: i32, %arg1: i32) -> (i32, i32, i32) {
    %c0_i32 = arith.constant 0 : i32
    %c0_i32_0 = arith.constant 0 : i32
    %c0_i32_1 = arith.constant 0 : i32
    return %arg0, %c0_i32, %c0_i32_0 : i32, i32, i32
  }
  func.func @transform_1(%arg0: i32, %arg1: i32) -> (i32, i32, i32) {
    %c0_i32 = arith.constant 0 : i32
    %c0_i32_0 = arith.constant 0 : i32
    %c0_i32_1 = arith.constant 0 : i32
    return %arg0, %c0_i32, %c0_i32_0 : i32, i32, i32
  }
  func.func @transform_2(%arg0: i32, %arg1: i32) -> (i32, i32) {
    %c0_i32 = arith.constant 0 : i32
    %c0_i32_0 = arith.constant 0 : i32
    %c0_i32_1 = arith.constant 0 : i32
    return %c0_i32, %c0_i32_0 : i32, i32
  }
  func.func @transform_3(%arg0: i32, %arg1: i32) -> (i32, i32) {
    %c0_i32 = arith.constant 0 : i32
    %c0_i32_0 = arith.constant 0 : i32
    %c0_i32_1 = arith.constant 0 : i32
    return %c0_i32, %c0_i32_0 : i32, i32
  }
  func.func @transform_4(%arg0: i32, %arg1: i32) -> (i32, i32) {
    %c0_i32 = arith.constant 0 : i32
    %c0_i32_0 = arith.constant 0 : i32
    %c0_i32_1 = arith.constant 0 : i32
    return %c0_i32, %c0_i32_0 : i32, i32
  }
  func.func @transform_5(%arg0: i32, %arg1: i32) -> (i32, i32) {
    %c0_i32 = arith.constant 0 : i32
    %c0_i32_0 = arith.constant 0 : i32
    %c0_i32_1 = arith.constant 0 : i32
    return %c0_i32, %c0_i32_0 : i32, i32
  }
  func.func @transform_6(%arg0: i32, %arg1: i32) -> (i32, i32) {
    %c0_i32 = arith.constant 0 : i32
    %c0_i32_0 = arith.constant 0 : i32
    %c0_i32_1 = arith.constant 0 : i32
    return %c0_i32, %c0_i32_0 : i32, i32
  }
  func.func @transform_7(%arg0: i32, %arg1: i32) -> (i32, i32) {
    %c0_i32 = arith.constant 0 : i32
    %c0_i32_0 = arith.constant 0 : i32
    %c0_i32_1 = arith.constant 0 : i32
    return %c0_i32, %c0_i32_0 : i32, i32
  }
  func.func @transform_8(%arg0: i32, %arg1: i32) -> (i32, i32) {
    %c0_i32 = arith.constant 0 : i32
    %c0_i32_0 = arith.constant 0 : i32
    %c0_i32_1 = arith.constant 0 : i32
    return %c0_i32, %c0_i32_0 : i32, i32
  }
  func.func @transform_9(%arg0: i32, %arg1: i32) -> (i32, i32) {
    %c0_i32 = arith.constant 0 : i32
    %c0_i32_0 = arith.constant 0 : i32
    %c0_i32_1 = arith.constant 0 : i32
    return %c0_i32, %c0_i32_0 : i32, i32
  }
  func.func @transform_10(%arg0: i32, %arg1: i32) -> (i32, i32) {
    %c0_i32 = arith.constant 0 : i32
    %c0_i32_0 = arith.constant 0 : i32
    %c0_i32_1 = arith.constant 0 : i32
    return %c0_i32, %c0_i32_0 : i32, i32
  }
  func.func @transform_11(%arg0: i32, %arg1: i32) -> (i32, i32) {
    %c0_i32 = arith.constant 0 : i32
    %c0_i32_0 = arith.constant 0 : i32
    %c0_i32_1 = arith.constant 0 : i32
    return %c0_i32, %c0_i32_0 : i32, i32
  }
  func.func @transform_12(%arg0: i32, %arg1: i32) -> (i32, i32, i32) {
    %c0_i32 = arith.constant 0 : i32
    %c0_i32_0 = arith.constant 0 : i32
    return %arg0, %arg1, %c0_i32 : i32, i32, i32
  }
}

</mosaic_0001>

<bundles_post_ra>
// kernel: tpu_custom_call.1
= control target key start
LH: loop header
LB: loop body
LE: loop exit
PB: predicated region body
PF: predicated region fallthrough
CT: control target
= control target key end

     0   :  { %s2244_s0 = inlined_call_operand.hbm [shape: f32[2,16,32], index: 0, kind: input, shape index: {}]   ;;  %s2245_s1 = inlined_call_operand.hbm [shape: f32[2,1,16], index: 1, kind: input, shape index: {}]   ;;  %s2246_s2 = inlined_call_operand.hbm [shape: bf16[32,32], index: 2, kind: input, shape index: {}]   ;;  %s2247_s3 = inlined_call_operand.hbm [shape: bf16[32,32], index: 3, kind: input, shape index: {}]   ;;  %s2248_s4 = inlined_call_operand.hbm [shape: bf16[32,32], index: 4, kind: input, shape index: {}]   ;;  %s2249_s5 = inlined_call_operand.hbm [shape: bf16[32,32], index: 5, kind: input, shape index: {}]   ;;  %s2250_s6 = inlined_call_operand.vmem [shape: f32[1,32], index: 6, kind: input, shape index: {}]   ;;  %s2251_s7 = inlined_call_operand.vmem [shape: f32[1,32], index: 7, kind: input, shape index: {}]   ;;  %s2252_s8 = inlined_call_operand.vmem [shape: f32[1,32], index: 8, kind: input, shape index: {}]   ;;  %s2253_s9 = inlined_call_operand.vmem [shape: f32[1,32], index: 9, kind: input, shape index: {}]   ;;  %s2254_s10 = inlined_call_operand.vmem [shape: f32[1,32], index: 10, kind: input, shape index: {}]   ;;  %s2255_s11 = inlined_call_operand.vmem [shape: f32[1,32], index: 11, kind: input, shape index: {}]   ;;  %s2256_s12 = inlined_call_operand.hbm [shape: f32[2,16,32], index: 12, kind: output, shape index: {}]  }
   0x1   :  { %2264 = sst [smem:[#allocation29_spill]] %s2246_s2 }
   0x2   :  { %2265 = sst [smem:[#allocation30_spill]] %s2247_s3 }
   0x3   :  { %2266 = sst [smem:[#allocation31_spill]] %s2248_s4 }
   0x4   :  { %2267 = sst [smem:[#allocation32_spill]] %s2249_s5 }
   0x5   :  { %2268 = sst [smem:[#allocation33_spill]] %s2254_s10 }
   0x6   :  { %2269 = sst [smem:[#allocation34_spill]] %s2255_s11 }
   0x7   :  { %2270 = sst [smem:[#allocation35_spill]] %s2256_s12 }
   0x8   :  { %17 = vsyncpa [#allocation6], 0 }
   0x9   :  { %19 = vsyncpa [#allocation6 + $0x1], 0 }
   0xa   :  { %20 = vsyncpa [#allocation9], 0 }
   0xb   :  { %22 = vsyncpa [#allocation9 + $0x1], 0 }
   0xc   :  { %23 = vsyncpa [#allocation12], 0 }
   0xd   :  { %24 = vsyncpa [#allocation15], 0 }
   0xe   :  { %25 = vsyncpa [#allocation7], 0 }
   0xf   :  { %27 = vsyncpa [#allocation7 + $0x1], 0  ;;  %s1968_s21 = smov 0   ;;  %s1970_s22 = smov 0  }
  0x10   :  { %s1972_s23 = smov 0   ;;  %s1974_s24 = smov 0  }
  0x11   :  { %s1976_s25 = smov 0   ;;  %s1978_s26 = smov 0  }
  0x12 LB: > { %2271 = sst [smem:[#allocation23_spill]] %s1865_s21  ;;  %s1999_s27 = sadd.s32 4294967295, %s1885_s26   ;;  %s1885_s26 = sphi %s1978_s26, %s33_s26   ;;  %s1881_s25 = sphi %s1976_s25, %s2299_s25   ;;  %s1877_s24 = sphi %s1974_s24, %s2298_s24   ;;  %s1873_s23 = sphi %s1972_s23, %s2294_s23   ;;  %s1869_s22 = sphi %s1970_s22, %s2297_s22   ;;  %s1865_s21 = sphi %s1968_s21, %s2296_s21  }
  0x13   : > { %2272 = sst [smem:[#allocation24_spill]] %s1873_s23  ;;  %s1340_s28 = sadd.s32 4294967294, %s1885_s26  }
  0x14   : > { %p65_p0 = scmp.ne.s32.totalorder %s1869_s22, %s1865_s21  ;;  %p66_p1 = scmp.eq.s32.totalorder %s1999_s27, 0 }
  0x15   : > { %p327_p2 = scmp.eq.s32.totalorder %s1999_s27, 1  ;;  %p333_p3 = scmp.eq.s32.totalorder %s1340_s28, 1 }
  0x16   : > { %p2008_p4 = por %p66_p1, %p65_p0  ;;  %p1341_p5 = scmp.ge.s32.totalorder %s1885_s26, 1 }
  0x17   : > { %p2013_p6 = por %p333_p3, %p65_p0  ;;  %p340_p7 = scmp.lt.s32.totalorder %s1885_s26, 3 }
  0x18   : > { %s2276_s2 = sld [smem:[#allocation29_spill]]  ;;  %s1887_s17 = smov [#allocation10]  }
  0x19   : > { %s2274_s30 = scalar_select %p2013_p6, 1, 0 }
  0x1a   : > { %p2021_p8 = pnand %p1341_p5, %p340_p7  ;;  %s353_s18 = sshll.u32 %s1887_s17, 4  ;;  %s354_s18 = int_to_ptr.vmem [resolvable:$true] %s353_s18 }
  0x1b   : > { %2275 = sst [smem:[#allocation25_spill]] %s2274_s30  ;;  %p1346_p11 = scmp.ge.s32.totalorder %s1885_s26, 2 }
  0x1c   : > { %p1463_p9 = pneg %p2021_p8  ;;  %s2279_s3 = sld [smem:[#allocation30_spill]] }
  0x1d   : > { %s1888_s14 = smov 64   ;;  %s1890_s17 = smov [#allocation11]  }
  0x1e   : > { %s351_s15 = sshll.u32 %s2276_s2, 4  ;;  %p2029_p10 = pnand %p1463_p9, %p66_p1  ;;  %s352_s15 = int_to_ptr.hbm [resolvable:$true] %s351_s15 }
  0x1f   : > { %s1889_s2 = smov 4   ;;  %s367_s30 = sshll.u32 %s1890_s17, 4  ;;  %s368_s30 = int_to_ptr.vmem [resolvable:$true] %s367_s30 }
  0x20   : > { %1466 = dma.hbm_to_vmem [thread:$0]  (!%p2029_p10), %s352_s15, 256, %s354_s18, [#allocation9], %s1888_s14, %s1888_s14, %s1889_s2  }
  0x21   : > { %s2280_s4 = sld [smem:[#allocation31_spill]]  ;;  %s1891_s18 = smov [#allocation13]  }
  0x22   : > { %s365_s13 = sshll.u32 %s2279_s3, 4  ;;  %s2281_s5 = sld [smem:[#allocation32_spill]]  ;;  %s366_s13 = int_to_ptr.hbm [resolvable:$true] %s365_s13 }
  0x23   : > { %1469 = dma.hbm_to_vmem [thread:$0]  (!%p2029_p10), %s366_s13, 256, %s368_s30, [#allocation12], %s1888_s14, %s1888_s14, %s1889_s2  }
  0x24   : > { %s381_s3 = sshll.u32 %s1891_s18, 4  ;;  %s1892_s12 = smov [#allocation14]   ;;  %s382_s3 = int_to_ptr.vmem [resolvable:$true] %s381_s3 }
  0x25   : > { %s395_s21 = sshll.u32 %s1892_s12, 4  ;;  %s45_s30 = sadd.s32 1, %s1881_s25  ;;  %s396_s21 = int_to_ptr.vmem [resolvable:$true] %s395_s21 }
  0x26   : > { %s52_s13 = sadd.s32 1, %s1873_s23  ;;  %p47_p12 = scmp.ge.s32.totalorder %s45_s30, 2 }
  0x27   : > { %s379_s11 = sshll.u32 %s2280_s4, 4  ;;  %p59_p13 = scmp.ne.s32.totalorder %s1873_s23, %s1869_s22  ;;  %s380_s11 = int_to_ptr.hbm [resolvable:$true] %s379_s11 }
  0x28   : > { %s393_s15 = sshll.u32 %s2281_s5, 4  ;;  %p60_p0 = scmp.eq.s32.totalorder %s1885_s26, 0  ;;  %s394_s15 = int_to_ptr.hbm [resolvable:$true] %s393_s15 }
  0x29   : > { %1472 = dma.hbm_to_vmem [thread:$0]  (!%p2029_p10), %s380_s11, 256, %s382_s3, [#allocation12], %s1888_s14, %s1888_s14, %s1889_s2  }
  0x2a   : > { %1475 = dma.hbm_to_vmem [thread:$0]  (!%p2029_p10), %s394_s15, 256, %s396_s21, [#allocation15], %s1888_s14, %s1888_s14, %s1889_s2  }
  0x2b   : > { %p1491_p3 = scmp.lt.s32.totalorder %s1885_s26, 2  ;;  %s2301_s30 = smov (%p47_p12, %s45_s30), 0 }
  0x2c   : > { %2282 = sst [smem:[#allocation26_spill]] %s2301_s30  ;;  %p2059_p5 = por %p60_p0, %p59_p13 }
  0x2d   : > { %p2065_p7 = por %p327_p2, %p59_p13  ;;  %s49_s2 = ssub.s32 %s1881_s25, %s2301_s30 }
  0x2e   : > { %s427_s19 = sand.u32 1, %s1873_s23   ;;  %p50_p9 = scmp.eq.s32.totalorder %s49_s2, 0 }
  0x2f   : > { %s2284_s11 = scalar_select %p2065_p7, 1, 0 }
  0x30   : > { %s1347_s14 = sshll.u32 %s427_s19, 4  ;;  %s1426_s17 = sshll.u32 %s1881_s25, 4 }
  0x31   : > { %2285 = sst [smem:[#allocation27_spill]] %s2284_s11  ;;  %s436_s18 = scalar_lea.hbm %s2244_s0, %s1426_s17 }
  0x32   : > { %s2074_s20 = scalar_select %p50_p9, %s1873_s23, %s52_s13  }
  0x33   : > { %s437_s12 = sshll.u32 %s436_s18, 4  ;;  %s431_s21 = scalar_lea.vmem [#allocation5], %s1347_s14  ;;  %s438_s12 = int_to_ptr.hbm [resolvable:$true] %s437_s12 }
  0x34   : > { %2286 = sst [smem:[#allocation28_spill]] %s2074_s20  ;;  %s439_s4 = sshll.u32 %s431_s21, 4  ;;  %s440_s4 = int_to_ptr.vmem [resolvable:$true] %s439_s4 }
  0x35   : > { %p1477_p2 = pnand %p1491_p3, %p2059_p5  ;;  %s449_s5 = sand.u32 1, %s1885_s26  }
  0x36   : > { %s428_s30 = scalar_lea.sflag [#allocation6], %s427_s19  ;;  %s1893_s2 = smov 128  }
  0x37   : > { %s1894_s11 = smov 8   ;;  %s455_s20 = scalar_lea.hbm %s2245_s1, %s1881_s25 }
  0x38   : > { %1479 = dma.hbm_to_vmem [thread:$0]  (!%p1477_p2), %s438_s12, 256, %s440_s4, %s428_s30, %s1893_s2, %s1893_s2, %s1894_s11  }
  0x39   : > { %s457_s23 = sshll.u32 %s455_s20, 4  ;;  %s452_s28 = scalar_lea.vmem [#allocation8], %s427_s19  ;;  %s458_s23 = int_to_ptr.hbm [resolvable:$true] %s457_s23 }
  0x3a   : > { %s459_s17 = sshll.u32 %s452_s28, 4  ;;  %s450_s14 = scalar_lea.sflag [#allocation9], %s449_s5  ;;  %s460_s17 = int_to_ptr.vmem [resolvable:$true] %s459_s17 }
  0x3b   : > { %1482 = dma.hbm_to_vmem [thread:$0]  (!%p1477_p2), %s458_s23, 16, %s460_s17, %s450_s14  }
  0x3c   : > { %468 = sbr.rel (%p2021_p8) target bundleno = 1414 (0x586), region = 68  ;;  %s2091_s3 = sand.u32 (!%p2021_p8), 1, %s1869_s22  }
  0x3d   : > { %s1351_s4 = sshll.u32 (!%p2021_p8), %s2091_s3, 4  ;;  %s471_s10 = scalar_lea.sflag (!%p2021_p8), [#allocation6], %s2091_s3 }
  0x3e   : > { %s474_s30 = scalar_lea.vmem (!%p2021_p8), [#allocation5], %s1351_s4 }
  0x41   : > { %1840 = dma.done.wait (%p2008_p4), %s471_s10, 256  }
  0x42   : > { %1842 = vsyncadd (%p2008_p4), %s471_s10, 4294967040  ;;  %s480_s5 = sand.u32 1, %s1999_s27   ;;  %s483_s16 = scalar_lea.vmem [#allocation8], %s2091_s3 }
  0x43   : > { %s481_s23 = scalar_lea.sflag [#allocation9], %s480_s5 }
  0x44   : > { %1844 = dma.done.wait (%p2008_p4), %s481_s23, 16  }
  0x45   : > { %1846 = vsyncadd (%p2008_p4), %s481_s23, 4294967280 }
  0x46   : > { %1848 = dma.done.wait (%p66_p1), [#allocation9], 256  }
  0x47   : > { %1850 = vsyncadd (%p66_p1), [#allocation9], 4294967040 }
  0x48   : > { %1852 = dma.done.wait (%p66_p1), [#allocation12], 512  }
  0x49   : > { %1854 = vsyncadd (%p66_p1), [#allocation12], 4294966784 }
  0x4a   : > { %1856 = dma.done.wait (%p66_p1), [#allocation15], 256  }
  0x4b   : > { %1858 = vsyncadd (%p66_p1), [#allocation15], 4294967040  ;;  %v1428_v0 = vld [vmem:[#allocation11 + $0x8] sm:$0xff]  ;;  %v1427_v1 = vld [vmem:[#allocation11] sm:$0xff]  ;;  %vm578_vm0 = vcmask 261120   ;;  %s1895_s20 = smov 120  }
  0x4c   : > { %v2119_v2 = vld [vmem:[%s474_s30] sm:$0xff]  ;;  %v2121_v3 = vld [vmem:[%s474_s30 + $0x8] sm:$0xff]  ;;  %588 = vmatpush.bf16.msra.mxu0 %v1428_v0  ;;  %s1896_s15 = smov 104   ;;  %s1897_s18 = smov 112   ;;  %vm666_vm1 = vcmask 125952   ;;  %vm737_vm2 = vcmask 1043456  }
  0x4d   : > { %v1432_v4 = vld [vmem:[#allocation10 + $0x8] sm:$0xff]  ;;  %v1431_v5 = vld [vmem:[#allocation10] sm:$0xff]  ;;  %v557_v6 = vpack.c.bf16 %v2121_v3, %v2119_v2  ;;  %v1562_v7 = vld [vmem:[%s2251_s7] ss:$0 sm:$0xff]  ;;  %vm733_vm3 = vcmask 64512   ;;  %vm673_vm4 = vcmask 257024  }
  0x4e   : > { %711 = vmatpush.bf16.msra.mxu2 %v1432_v4  ;;  %v1563_v10 = vld [vmem:[%s2250_s6] ss:$0 sm:$0xff]  ;;  %v1430_v24 = vld [vmem:[#allocation13 + $0x8] sm:$0xff]  ;;  %v1429_v25 = vld [vmem:[#allocation13] sm:$0xff]  ;;  %vm755_vm5 = vcmask 130048   ;;  %vm806_vm6 = vcmask 60416  }
  0x4f   : > { %622 = vmatpush.bf16.msra.mxu1 %v1430_v24  ;;  %v1564_v45 = vld [vmem:[%s2252_s8] ss:$0 sm:$0xff]  ;;  %s1898_s2 = smov 16   ;;  %s1899_s13 = smov 8   ;;  %vm892_vm7 = vcmask 126016   ;;  %vm978_vm8 = vcmask 191616  }
  0x50   : > { %589 = vmatpush.bf16.msra.mxu0 %v1427_v1  ;;  %v1565_v53 = vld [vmem:[%s483_s16] ss:$0 sm:$0xff]  ;;  %s1900_s28 = smov 24   ;;  %vm1064_vm9 = vcmask 257216   ;;  %s2287_s5 = sld [smem:[#allocation33_spill]] }
  0x51   : > { %s2288_s27 = sld [smem:[#allocation34_spill]]  ;;  %s1440_s29 = sshll.u32 %s1877_s24, 4 }
  0x52   : > { %712 = vmatpush.bf16.msra.mxu2 %v1431_v5  ;;  %s548_s11 = scalar_lea.vmem [#allocation16], %s1351_s4  ;;  %s1179_s24 = scalar_lea.sflag [#allocation7], %s2091_s3 }
  0x53   : > { %1365 = vmatmul.msk.bf16.vlgmr.msra.gmra.mxu0 %vm578_vm0, %v557_v6  ;;  %623 = vmatpush.bf16.msra.mxu1 %v1429_v25  ;;  %s1193_s21 = sshll.u32 %s548_s11, 4  ;;  %s1194_s21 = int_to_ptr.vmem [resolvable:$true] %s1193_s21 }
  0x55   : > { %1383 = vmatmul.msk.bf16.vlgmr.msra.gmra.mxu2 %vm578_vm0, %v557_v6 }
  0x56   : > { %1374 = vmatmul.msk.bf16.vlgmr.msra.gmra.mxu1 %vm578_vm0, %v557_v6 }
  0xd0   : > { %v591_v8 = vpop.f32.mrf.mxu0 }
  0xd1   : > { %v592_v9 = vadd.f32 %v1562_v7, %v591_v8 }
  0xd3   : > { %630 = vxpose.xlu0.b32.start [1/2] (short) (narrow) %v592_v9, 32  ;;  %v625_v46 = vpop.f32.mrf.mxu1 }
  0xd4   : > { %v626_v47 = vadd.f32 %v1564_v45, %v625_v46 }
  0xd6   : > { %v671_v48 = vpack.c.bf16 %v626_v47, %v626_v47 }
  0xd8   : > { %v714_v11 = vpop.f32.mrf.mxu2  ;;  %v593_v12 = vpop.f32.mrf.mxu0  ;;  %674 = vst.msk [vmem:[#allocation3] sm:$0xf] %vm673_vm4, %v671_v48 }
  0xd9   : > { %v715_v13 = vadd.f32 %v1563_v10, %v714_v11  ;;  %v594_v14 = vadd.f32 %v1562_v7, %v593_v12 }
  0xdb   : > { %631 = vxpose.xlu0.b32.end [2/2] (short) (narrow) %v594_v14, 32  ;;  %v719_v15 = vmul.f32 0.35355338, %v715_v13  ;;  %v627_v49 = vpop.f32.mrf.mxu1 }
  0xdc   : > { %v628_v50 = vadd.f32 %v1564_v45, %v627_v49 }
  0xdd   : > { %v721_v17 = vpack.c.bf16 %v719_v15, %v719_v15 }
  0xde   : > { %v672_v51 = vpack.c.bf16 %v628_v50, %v628_v50 }
  0xdf   : > { %v730_v20 = vunpack.c.l.b16 %v721_v17 }
  0xe0   : > { %v716_v16 = vpop.f32.mrf.mxu2  ;;  %675 = vst.msk [vmem:[#allocation3 + $0x4] sm:$0xf] %vm673_vm4, %v672_v51 }
  0xe1   : > { %v717_v18 = vadd.f32 %v1563_v10, %v716_v16 }
  0xe3   : > { %v720_v19 = vmul.f32 0.35355338, %v717_v18 }
  0xe5   : > { %v722_v21 = vpack.c.bf16 %v720_v19, %v720_v19 }
  0xe7   : > { %v731_v22 = vunpack.c.l.b16 %v722_v21  ;;  %v1433_v52 = vld [vmem:[#allocation3] sm:$0xff] }
  0xe8   : > { %v1434_v6 = vld [vmem:[#allocation3] sm:$0xff] }
  0xe9   : > { %v732_v23 = vpack.c.b16 %v731_v22, %v730_v20  ;;  %v1435_v14 = vld [vmem:[#allocation3] sm:$0xff] }
  0xea   : > { %v1436_v18 = vld [vmem:[#allocation3] sm:$0xff] }
  0xeb   : > { %810 = vrot.lane.b32.xlu1 %v732_v23, %s1895_s20  ;;  %982 = vrot.lane.b32.xlu2 %v732_v23, %s1896_s15 }
  0xf3   : > { %896 = vrot.lane.b32.xlu1 %v732_v23, %s1897_s18 }
 0x145   : > { %v983_v44 = vpop.permute.xlu2 %982 }
 0x15d   : > { %v811_v34 = vpop.permute.xlu1 %810 }
 0x165   : > { %v897_v41 = vpop.permute.xlu1 %896 }
 0x177   : > { %v646_v26 = vpop.trf.xlu0 }
 0x178   : > { %v662_v27 = vpack.c.bf16 %v646_v26, %v646_v26 }
 0x17a   : > { %667 = vst.msk [vmem:[#allocation2] sm:$0xf] %vm666_vm1, %v662_v27 }
 0x17f   : > { %v647_v28 = vpop.trf.xlu0 }
 0x180   : > { %v663_v29 = vpack.c.bf16 %v647_v28, %v647_v28 }
 0x181   : > { %v724_v30 = vld [vmem:[#allocation2] sm:$0xf] }
 0x182   : > { %668 = vst.msk [vmem:[#allocation2 + $0x4] sm:$0xf] %vm666_vm1, %v663_v29  ;;  %v739_v31 = vsel %vm737_vm2, %v724_v30, 0 }
 0x183   : > { %748 = vmatpush.bf16.msra.mxu3 %v739_v31 }
 0x186   : > { %1384 = vmatmul.msk.bf16.vlgmr.msra.gmra.mxu3 %vm733_vm3, %v732_v23 }
 0x187   : > { %v648_v32 = vpop.trf.xlu0  ;;  %793 = vmatpush.bf16.msrb.mxu3 %v1433_v52 }
 0x188   : > { %v664_v33 = vpack.c.bf16 %v648_v32, %v648_v32 }
 0x189   : > { %v809_v35 = vld [vmem:[#allocation2 + $0x4] sm:$0xf] }
 0x18a   : > { %669 = vst.msk [vmem:[#allocation2 + $0x8] sm:$0xf] %vm666_vm1, %v664_v33  ;;  %v816_v36 = vsel %vm737_vm2, %v809_v35, 0 }
 0x18b   : > { %825 = vmatpush.bf16.msrb.mxu0 %v816_v36 }
 0x18e   : > { %1390 = vmatmul.msk.bf16.vlgmr.msrb.gmra.mxu0 %vm733_vm3, %v811_v34 }
 0x18f   : > { %v649_v37 = vpop.trf.xlu0 }
 0x190   : > { %v665_v38 = vpack.c.bf16 %v649_v37, %v649_v37 }
 0x191   : > { %v895_v39 = vld [vmem:[#allocation2 + $0x8] sm:$0xf] }
 0x192   : > { %670 = vst.msk [vmem:[#allocation2 + $0xc] sm:$0xf] %vm666_vm1, %v665_v38  ;;  %v902_v40 = vsel %vm737_vm2, %v895_v39, 0 }
 0x193   : > { %911 = vmatpush.bf16.msrb.mxu2 %v902_v40 }
 0x196   : > { %1396 = vmatmul.msk.bf16.vlgmr.msrb.gmra.mxu2 %vm733_vm3, %v897_v41 }
 0x199   : > { %v981_v42 = vld [vmem:[#allocation2 + $0xc] sm:$0xf] }
 0x19a   : > { %v988_v43 = vsel %vm737_vm2, %v981_v42, 0 }
 0x19b   : > { %997 = vmatpush.bf16.msra.mxu0 %v988_v43 }
 0x19e   : > { %1402 = vmatmul.msk.bf16.vlgmr.msra.gmra.mxu0 %vm733_vm3, %v983_v44 }
 0x209   : > { %v750_v54 = vpop.f32.mrf.mxu3 }
 0x20a   : > { %v751_v55 = vadd.f32 %v1565_v53, %v750_v54 }
 0x20b   : > { %v827_v56 = vpop.f32.mrf.mxu0 }
 0x20c   : > { %v828_v57 = vadd.f32 %v1565_v53, %v827_v56  ;;  %v756_v58 = vsel %vm755_vm5, %v751_v55, -inf }
 0x20d   : > { %757 = vmax.xlane.f32.xlu2 %v756_v58 }
 0x20e   : > { %v832_v59 = vsel %vm755_vm5, %v828_v57, -inf }
 0x20f   : > { %833 = vmax.xlane.f32.xlu1 %v832_v59 }
 0x211   : > { %v752_v60 = vpop.f32.mrf.mxu3 }
 0x212   : > { %v753_v61 = vadd.f32 %v1565_v53, %v752_v60 }
 0x213   : > { %v829_v63 = vpop.f32.mrf.mxu0 }
 0x214   : > { %v759_v62 = vsel %vm755_vm5, %v753_v61, -inf  ;;  %v830_v16 = vadd.f32 %v1565_v53, %v829_v63 }
 0x215   : > { %760 = vmax.xlane.f32.xlu0 %v759_v62 }
 0x216   : > { %v835_v17 = vsel %vm755_vm5, %v830_v16, -inf }
 0x219   : > { %v913_v0 = vpop.f32.mrf.mxu2 }
 0x21a   : > { %v914_v13 = vadd.f32 %v1565_v53, %v913_v0 }
 0x21b   : > { %v999_v5 = vpop.f32.mrf.mxu0 }
 0x21c   : > { %v1000_v8 = vadd.f32 %v1565_v53, %v999_v5  ;;  %v918_v15 = vsel %vm755_vm5, %v914_v13, -inf }
 0x21e   : > { %v1004_v9 = vsel %vm755_vm5, %v1000_v8, -inf }
 0x221   : > { %v915_v1 = vpop.f32.mrf.mxu2 }
 0x222   : > { %v916_v4 = vadd.f32 %v1565_v53, %v915_v1 }
 0x223   : > { %v1001_v10 = vpop.f32.mrf.mxu0 }
 0x224   : > { %v921_v7 = vsel %vm755_vm5, %v916_v4, -inf  ;;  %v2160_v11 = vadd.f32 %v1565_v53, %v1001_v10 }
 0x225   : > { %858 = vrot.lane.b32.xlu2 %v1434_v6, %s1895_s20  ;;  %922 = vmax.xlane.f32.xlu1 %v921_v7 }
 0x226   : > { %v1007_v12 = vsel %vm755_vm5, %v2160_v11, -inf }
 0x22d   : > { %1005 = vmax.xlane.f32.xlu1 %v1004_v9 }
 0x235   : > { %1008 = vmax.xlane.f32.xlu1 %v1007_v12 }
 0x24e   : > { %919 = vmax.xlane.f32.xlu2 %v918_v15  ;;  %944 = vrot.lane.b32.xlu1 %v1435_v14, %s1897_s18 }
 0x256   : > { %836 = vmax.xlane.f32.xlu2 %v835_v17 }
 0x26e   : > { %1030 = vrot.lane.b32.xlu2 %v1436_v18, %s1896_s15  ;;  %s2289_s15 = sld [smem:[#allocation35_spill]] }
 0x274   : > { %s1192_s12 = scalar_lea.hbm %s2289_s15, %s1440_s29  ;;  %s1807_s10 = scalar_lea.hbm %s2289_s15, 32 }
 0x280   : > { %v758_v19 = vpop.xlane.xlu2 %757 }
 0x281   : > { %v762_v21 = vsub.f32 %v751_v55, %v758_v19 }
 0x282   : > { %v834_v20 = vpop.xlane.xlu1 %833 }
 0x283   : > { %v838_v22 = vsub.f32 %v828_v57, %v834_v20  ;;  %v764_v23 = vmul.f32 1.442695, %v762_v21 }
 0x285   : > { %v840_v24 = vmul.f32 1.442695, %v838_v22  ;;  %1569 = vpow2.f32 %v764_v23 }
 0x287   : > { %1571 = vpow2.f32 %v840_v24 }
 0x288   : > { %v859_v25 = vpop.permute.xlu2 %858  ;;  %v761_v26 = vpop.xlane.xlu0 %760 }
 0x289   : > { %v763_v27 = vsub.f32 %v753_v61, %v761_v26  ;;  %871 = vmatpush.bf16.msrb.mxu1 %v859_v25 }
 0x28b   : > { %v766_v28 = vmul.f32 1.442695, %v763_v27  ;;  %v1570_v29 = vpop.eup %1569 }
 0x28c   : > { %v768_v39 = vsel %vm755_vm5, %v1570_v29, 0.0 }
 0x28d   : > { %1573 = vpow2.f32 %v766_v28  ;;  %v1572_v30 = vpop.eup %1571 }
 0x28e   : > { %v844_v33 = vsel %vm755_vm5, %v1572_v30, 0.0 }
 0x293   : > { %v1574_v31 = vpop.eup %1573 }
 0x294   : > { %v774_v32 = vpack.c.bf16 %v1574_v31, %v1570_v29  ;;  %v771_v0 = vsel %vm755_vm5, %v1574_v31, 0.0 }
 0x296   : > { %1389 = vmatmul.msk.bf16.vlgmr.msrb.gmra.mxu3 %vm755_vm5, %v774_v32 }
 0x297   : > { %845 = vadd.xlane.f32.xlu2 %v844_v33 }
 0x298   : > { %v923_v34 = vpop.xlane.xlu1 %922 }
 0x299   : > { %v925_v35 = vsub.f32 %v916_v4, %v923_v34 }
 0x29b   : > { %v928_v36 = vmul.f32 1.442695, %v925_v35 }
 0x29d   : > { %1575 = vpow2.f32 %v928_v36 }
 0x2a0   : > { %v1006_v40 = vpop.xlane.xlu1 %1005 }
 0x2a1   : > { %v1010_v45 = vsub.f32 %v1000_v8, %v1006_v40 }
 0x2a3   : > { %v1576_v37 = vpop.eup %1575  ;;  %v1012_v47 = vmul.f32 1.442695, %v1010_v45  ;;  %v1438_v45 = vld [vmem:[#allocation14] sm:$0xff] }
 0x2a4   : > { %v933_v38 = vsel %vm755_vm5, %v1576_v37, 0.0 }
 0x2a5   : > { %934 = vadd.xlane.f32.xlu0 %v933_v38 }
 0x2a8   : > { %v1009_v41 = vpop.xlane.xlu1 %1008 }
 0x2a9   : > { %v1011_v51 = vsub.f32 %v2160_v11, %v1009_v41 }
 0x2ab   : > { %v1014_v55 = vmul.f32 1.442695, %v1011_v51 }
 0x2ad   : > { %769 = vadd.xlane.f32.xlu0 %v768_v39 }
 0x2c0   : > { %v945_v42 = vpop.permute.xlu1 %944 }
 0x2c1   : > { %v920_v43 = vpop.xlane.xlu2 %919  ;;  %957 = vmatpush.bf16.msra.mxu3 %v945_v42 }
 0x2c2   : > { %v924_v44 = vsub.f32 %v914_v13, %v920_v43 }
 0x2c4   : > { %v926_v46 = vmul.f32 1.442695, %v924_v44  ;;  %v1439_v44 = vld [vmem:[#allocation14 + $0x8] sm:$0xff] }
 0x2c5   : > { %1103 = vmatpush.bf16.msra.mxu2 %v1439_v44 }
 0x2c6   : > { %1577 = vpow2.f32 %v926_v46 }
 0x2c7   : > { %1579 = vpow2.f32 %v1012_v47 }
 0x2c9   : > { %v837_v48 = vpop.xlane.xlu2 %836  ;;  %1104 = vmatpush.bf16.msra.mxu2 %v1438_v45 }
 0x2ca   : > { %v839_v49 = vsub.f32 %v830_v16, %v837_v48 }
 0x2cc   : > { %v1578_v50 = vpop.eup %1577  ;;  %v842_v52 = vmul.f32 1.442695, %v839_v49 }
 0x2cd   : > { %v936_v53 = vpack.c.bf16 %v1576_v37, %v1578_v50  ;;  %v930_v54 = vsel %vm755_vm5, %v1578_v50, 0.0  ;;  %v1580_v57 = vpop.eup %1579 }
 0x2ce   : > { %1581 = vpow2.f32 %v842_v52  ;;  %931 = vadd.xlane.f32.xlu2 %v930_v54  ;;  %v1016_v60 = vsel %vm755_vm5, %v1580_v57, 0.0 }
 0x2cf   : > { %1401 = vmatmul.msk.bf16.vlgmr.msra.gmra.mxu3 %vm755_vm5, %v936_v53  ;;  %1583 = vpow2.f32 %v1014_v55  ;;  %v1566_v53 = vld [vmem:[%s2253_s9] ss:$0 sm:$0xff] }
 0x2d1   : > { %v1031_v56 = vpop.permute.xlu2 %1030 }
 0x2d2   : > { %1043 = vmatpush.bf16.msra.mxu1 %v1031_v56 }
 0x2d4   : > { %v1582_v58 = vpop.eup %1581 }
 0x2d5   : > { %v847_v59 = vsel %vm755_vm5, %v1582_v58, 0.0  ;;  %v850_v61 = vpack.c.bf16 %v1582_v58, %v1572_v30  ;;  %v1584_v62 = vpop.eup %1583 }
 0x2d6   : > { %848 = vadd.xlane.f32.xlu1 %v847_v59  ;;  %1017 = vadd.xlane.f32.xlu2 %v1016_v60  ;;  %v1019_v63 = vsel %vm755_vm5, %v1584_v62, 0.0  ;;  %v1022_v1 = vpack.c.bf16 %v1584_v62, %v1580_v57  ;;  %v1901_v62 = vmov 32.0  }
 0x2d7   : > { %1395 = vmatmul.msk.bf16.vlgmr.msrb.gmra.mxu1 %vm755_vm5, %v850_v61 }
 0x2de   : > { %1020 = vadd.xlane.f32.xlu1 %v1019_v63  ;;  %772 = vadd.xlane.f32.xlu2 %v771_v0 }
 0x2e7   : > { %1407 = vmatmul.msk.bf16.vlgmr.msra.gmra.mxu1 %vm755_vm5, %v1022_v1 }
 0x30a   : > { %v846_v10 = vpop.xlane.xlu2 %845 }
 0x318   : > { %v935_v4 = vpop.xlane.xlu0 %934 }
 0x319   : > { %v795_v7 = vpop.f32.mrf.mxu3 }
 0x320   : > { %v770_v5 = vpop.xlane.xlu0 %769 }
 0x321   : > { %1585 = vrcp.f32 %v770_v5  ;;  %v797_v13 = vpop.f32.mrf.mxu3 }
 0x327   : > { %v1586_v6 = vpop.eup %1585 }
 0x328   : > { %v802_v8 = vmul.f32 %v1586_v6, %v795_v7 }
 0x32a   : > { %v804_v9 = vpack.c.bf16 %v802_v8, %v802_v8 }
 0x32c   : > { %807 = vst.msk [vmem:[#allocation4] sm:$0xf] %vm806_vm6, %v804_v9 }
 0x341   : > { %v932_v11 = vpop.xlane.xlu2 %931 }
 0x342   : > { %1587 = vrcp.f32 %v932_v11 }
 0x343   : > { %1589 = vrcp.f32 %v846_v10 }
 0x348   : > { %v1588_v15 = vpop.eup %1587 }
 0x349   : > { %v1018_v12 = vpop.xlane.xlu2 %1017  ;;  %v849_v17 = vpop.xlane.xlu1 %848 }
 0x34a   : > { %v1590_v19 = vpop.eup %1589 }
 0x351   : > { %v773_v14 = vpop.xlane.xlu2 %772  ;;  %v1021_v33 = vpop.xlane.xlu1 %1020 }
 0x352   : > { %v959_v16 = vpop.f32.mrf.mxu3  ;;  %1591 = vrcp.f32 %v773_v14 }
 0x353   : > { %v966_v18 = vmul.f32 %v1588_v15, %v959_v16  ;;  %1593 = vrcp.f32 %v849_v17 }
 0x354   : > { %v873_v20 = vpop.f32.mrf.mxu1  ;;  %1595 = vrcp.f32 %v935_v4 }
 0x355   : > { %v968_v21 = vpack.c.bf16 %v966_v18, %v966_v18  ;;  %v880_v22 = vmul.f32 %v1590_v19, %v873_v20  ;;  %1597 = vrcp.f32 %v1018_v12 }
 0x356   : > { %1599 = vrcp.f32 %v1021_v33 }
 0x357   : > { %v882_v23 = vpack.c.bf16 %v880_v22, %v880_v22  ;;  %972 = vrot.lane.b32.xlu2 %v968_v21, %s1898_s2  ;;  %1601 = vrcp.f32 %v1901_v62 }
 0x358   : > { %v1592_v24 = vpop.eup %1591 }
 0x359   : > { %886 = vrot.lane.b32.xlu1 %v882_v23, %s1899_s13  ;;  %v803_v25 = vmul.f32 %v1592_v24, %v797_v13  ;;  %v1594_v26 = vpop.eup %1593 }
 0x35a   : > { %v961_v31 = vpop.f32.mrf.mxu3  ;;  %v1596_v32 = vpop.eup %1595 }
 0x35b   : > { %v805_v27 = vpack.c.bf16 %v803_v25, %v803_v25  ;;  %v967_v34 = vmul.f32 %v1596_v32, %v961_v31  ;;  %v1598_v35 = vpop.eup %1597  ;;  %v1568_v32 = vld [vmem:[%s2288_s27] ss:$0 sm:$0xff] }
 0x35c   : > { %v875_v28 = vpop.f32.mrf.mxu1  ;;  %v1600_v40 = vpop.eup %1599 }
 0x35d   : > { %v881_v29 = vmul.f32 %v1594_v26, %v875_v28  ;;  %808 = vst.msk [vmem:[#allocation4 + $0x4] sm:$0xf] %vm806_vm6, %v805_v27  ;;  %v969_v38 = vpack.c.bf16 %v967_v34, %v967_v34  ;;  %v1602_v63 = vpop.eup %1601  ;;  %v1567_v27 = vld [vmem:[%s2287_s5] ss:$0 sm:$0xff] }
 0x35e   : > { %v1122_v0 = vmul.f32 32.0, %v1602_v63  ;;  %vm1126_vm10 = vweird.f32 %v1602_v63 }
 0x35f   : > { %v883_v30 = vpack.c.bf16 %v881_v29, %v881_v29 }
 0x360   : > { %v1123_v1 = vsub.f32 1.0, %v1122_v0 }
 0x361   : > { %888 = vrot.lane.b32.xlu0 %v883_v30, %s1899_s13 }
 0x362   : > { %v1124_v4 = vmul.f32 %v1602_v63, %v1123_v1 }
 0x364   : > { %v1045_v36 = vpop.f32.mrf.mxu1  ;;  %v1125_v5 = vadd.f32 %v1602_v63, %v1124_v4 }
 0x365   : > { %v1052_v37 = vmul.f32 %v1598_v35, %v1045_v36 }
 0x366   : > { %v1127_v6 = vsel %vm1126_vm10, %v1602_v63, %v1125_v5 }
 0x367   : > { %v1054_v39 = vpack.c.bf16 %v1052_v37, %v1052_v37 }
 0x369   : > { %1058 = vrot.lane.b32.xlu1 %v1054_v39, %s1900_s28  ;;  %974 = vrot.lane.b32.xlu0 %v969_v38, %s1898_s2  ;;  %s1195_s2 = sshll.u32 %s1192_s12, 4  ;;  %s1196_s2 = int_to_ptr.hbm [resolvable:$true] %s1195_s2 }
 0x36c   : > { %v1047_v41 = vpop.f32.mrf.mxu1 }
 0x36d   : > { %v1053_v42 = vmul.f32 %v1600_v40, %v1047_v41 }
 0x36f   : > { %v1055_v43 = vpack.c.bf16 %v1053_v42, %v1053_v42 }
 0x371   : > { %1060 = vrot.lane.b32.xlu2 %v1055_v43, %s1900_s28  ;;  %s1801_s28 = sshra.s32 %s1196_s2, 4  ;;  %s1802_s28 = int_to_ptr.hbm [resolvable:$true] %s1801_s28 }
 0x372   : > { %s1803_s4 = scalar_lea.hbm %s1802_s28, 16  ;;  %p1808_p10 = scmp.lt.s32.totalorder %s1802_s28, %s2289_s15 }
 0x373   : > { %p1804_p1 = scmp.ne.s32.totalorder %s1802_s28, %s1803_s4  ;;  %p1809_p12 = scmp.lt.s32.totalorder %s1807_s10, %s1803_s4 }
 0x375   : > { %p1805_p4 = pnand %p1804_p1, %p2065_p7  ;;  %p1810_p13 = por %p1809_p12, %p1808_p10 }
 0x377   : > { %p1806_p8 = pneg %p1805_p4 }
 0x379   : > { %p1811_p0 = pnand %p1810_p13, %p1806_p8 }
 0x3b1   : > { %v973_v47 = vpop.permute.xlu2 %972 }
 0x3cb   : > { %v887_v46 = vpop.permute.xlu1 %886  ;;  %v1061_v51 = vpop.permute.xlu2 %1060 }
 0x3cc   : > { %893 = vst.msk [vmem:[#allocation4] sm:$0xf] %vm892_vm7, %v887_v46 }
 0x3cd   : > { %979 = vst.msk [vmem:[#allocation4] sm:$0xf] %vm978_vm8, %v973_v47 }
 0x3d3   : > { %v889_v48 = vpop.permute.xlu0 %888 }
 0x3d4   : > { %894 = vst.msk [vmem:[#allocation4 + $0x4] sm:$0xf] %vm892_vm7, %v889_v48 }
 0x3db   : > { %v1059_v49 = vpop.permute.xlu1 %1058  ;;  %v975_v50 = vpop.permute.xlu0 %974 }
 0x3dc   : > { %1065 = vst.msk [vmem:[#allocation4] sm:$0xf] %vm1064_vm9, %v1059_v49 }
 0x3dd   : > { %980 = vst.msk [vmem:[#allocation4 + $0x4] sm:$0xf] %vm978_vm8, %v975_v50 }
 0x3de   : > { %1066 = vst.msk [vmem:[#allocation4 + $0x4] sm:$0xf] %vm1064_vm9, %v1061_v51 }
 0x3e5   : > { %v1437_v52 = vld [vmem:[#allocation4] sm:$0xff] }
 0x3e6   : > { %1420 = vmatmul.msk.bf16.vlgmr.msra.gmra.mxu2 %vm578_vm0, %v1437_v52 }
 0x469   : > { %v1106_v54 = vpop.f32.mrf.mxu2 }
 0x46a   : > { %v1107_v55 = vadd.f32 %v1566_v53, %v1106_v54 }
 0x46c   : > { %v1111_v56 = vadd.f32 %v1107_v55, %v2119_v2 }
 0x46e   : > { %v1115_v57 = vsel %vm578_vm0, %v1111_v56, 0.0 }
 0x46f   : > { %1116 = vadd.xlane.f32.xlu0 %v1115_v57 }
 0x471   : > { %v1108_v58 = vpop.f32.mrf.mxu2 }
 0x472   : > { %v1109_v59 = vadd.f32 %v1566_v53, %v1108_v58 }
 0x474   : > { %v1112_v60 = vadd.f32 %v1109_v59, %v2121_v3 }
 0x476   : > { %v1118_v61 = vsel %vm578_vm0, %v1112_v60, 0.0 }
 0x477   : > { %1119 = vadd.xlane.f32.xlu1 %v1118_v61 }
 0x4e2   : > { %v1117_v2 = vpop.xlane.xlu0 %1116 }
 0x4e3   : > { %v1128_v7 = vmul.f32 %v1127_v6, %v1117_v2 }
 0x4e5   : > { %v1130_v8 = vsub.f32 %v1111_v56, %v1128_v7 }
 0x4e7   : > { %v1132_v9 = vmul.f32 %v1130_v8, %v1130_v8 }
 0x4e9   : > { %v1134_v10 = vsel %vm578_vm0, %v1132_v9, 0.0 }
 0x4ea   : > { %v1120_v11 = vpop.xlane.xlu1 %1119  ;;  %1135 = vadd.xlane.f32.xlu2 %v1134_v10 }
 0x4eb   : > { %v1129_v3 = vmul.f32 %v1127_v6, %v1120_v11 }
 0x4ed   : > { %v1131_v12 = vsub.f32 %v1112_v60, %v1129_v3 }
 0x4ef   : > { %v1133_v13 = vmul.f32 %v1131_v12, %v1131_v12 }
 0x4f1   : > { %v1137_v14 = vsel %vm578_vm0, %v1133_v13, 0.0 }
 0x4f2   : > { %1138 = vadd.xlane.f32.xlu0 %v1137_v14 }
 0x55d   : > { %v1136_v15 = vpop.xlane.xlu2 %1135 }
 0x55e   : > { %v1140_v16 = vmul.f32 %v1136_v15, %v1127_v6 }
 0x560   : > { %v1142_v17 = vadd.f32 1e-12, %v1140_v16 }
 0x562   : > { %1603 = vrsqrt.f32 %v1142_v17  ;;  %vm1150_vm12 = vweird.f32 %v1142_v17 }
 0x565   : > { %v1139_v18 = vpop.xlane.xlu0 %1138 }
 0x566   : > { %v1141_v19 = vmul.f32 %v1139_v18, %v1127_v6 }
 0x568   : > { %v1604_v20 = vpop.eup %1603  ;;  %v1143_v21 = vadd.f32 1e-12, %v1141_v19 }
 0x569   : > { %v1145_v22 = vmul.f32 %v1604_v20, %v1142_v17  ;;  %vm1151_vm11 = vweird.f32 %v1604_v20 }
 0x56a   : > { %1605 = vrsqrt.f32 %v1143_v21  ;;  %vm1152_vm13 = vmor %vm1150_vm12, %vm1151_vm11  ;;  %vm1160_vm15 = vweird.f32 %v1143_v21 }
 0x56b   : > { %v1146_v23 = vmul.f32 %v1604_v20, %v1145_v22 }
 0x56d   : > { %v1147_v24 = vmul.f32 0.5, %v1146_v23 }
 0x56f   : > { %v1148_v25 = vsub.f32 1.5, %v1147_v24 }
 0x570   : > { %v1606_v26 = vpop.eup %1605 }
 0x571   : > { %v1149_v28 = vmul.f32 %v1604_v20, %v1148_v25  ;;  %v1155_v29 = vmul.f32 %v1606_v26, %v1143_v21  ;;  %vm1161_vm14 = vweird.f32 %v1606_v26 }
 0x572   : > { %vm1162_vm1 = vmor %vm1160_vm15, %vm1161_vm14 }
 0x573   : > { %v1153_v30 = vsel %vm1152_vm13, %v1604_v20, %v1149_v28  ;;  %v1156_v31 = vmul.f32 %v1606_v26, %v1155_v29 }
 0x574   : > { %v1167_v33 = vmul.f32 %v1567_v27, %v1153_v30 }
 0x575   : > { %v1157_v34 = vmul.f32 0.5, %v1156_v31 }
 0x576   : > { %v1169_v35 = vmul.f32 %v1167_v33, %v1130_v8 }
 0x577   : > { %v1158_v36 = vsub.f32 1.5, %v1157_v34 }
 0x578   : > { %v1174_v37 = vadd.f32 %v1568_v32, %v1169_v35 }
 0x579   : > { %v1159_v38 = vmul.f32 %v1606_v26, %v1158_v36 }
 0x57a   : > { %1176 = vst.msk [vmem:[%s548_s11] sm:$0xff] %vm578_vm0, %v1174_v37 }
 0x57b   : > { %v1163_v39 = vsel %vm1162_vm1, %v1606_v26, %v1159_v38 }
 0x57c   : > { %v1168_v40 = vmul.f32 %v1567_v27, %v1163_v39 }
 0x57e   : > { %v1170_v41 = vmul.f32 %v1168_v40, %v1131_v12 }
 0x580   : > { %v1175_v42 = vadd.f32 %v1568_v32, %v1170_v41 }
 0x582   : > { %1177 = vst.msk [vmem:[%s548_s11 + $0x8] sm:$0xff] %vm578_vm0, %v1175_v42 }
 0x583   : > { %1814 = shalt.err (!%p1811_p0)
}
 0x584   : > { %s1902_s3 = smov 128  }
 0x585   : > { %1461 = dma.vmem_to_hbm [thread:$0]  (%p2065_p7), %s1194_s21, 256, %s1196_s2, %s1179_s24, %s1902_s3, %s1902_s3, %s1899_s13  }
 0x586 PF: > { %s2291_s23 = sld [smem:[#allocation23_spill]]  ;;  %p1484_p3 = pnand %p1346_p11, %p2013_p6 }
 0x588   : > { %p1485_p5 = pneg %p1484_p3 }
 0x58c   : > { %s1210_s27 = sand.u32 1, %s2291_s23  }
 0x58d   : > { %s1211_s29 = scalar_lea.sflag [#allocation7], %s1210_s27 }
 0x58e   : > { %1860 = dma.done.wait (%p1485_p5), %s1211_s29, 256  }
 0x58f   : > { %1862 = vsyncadd (%p1485_p5), %s1211_s29, 4294967040  ;;  %s33_s26 = sadd.s32 1, %s1885_s26   ;;  %s2293_s11 = sld [smem:[#allocation24_spill]] }
 0x590   : > { %p30_p9 = scmp.ge.s32.totalorder %s33_s26, 4   ;;  %s2294_s23 = sld [smem:[#allocation28_spill]] }
 0x591   : > { %s2295_s13 = sld [smem:[#allocation26_spill]]  ;;  %s2296_s21 = smov %s1869_s22 }
 0x592   : > { %s2298_s24 = smov %s1881_s25 }
 0x593   :  { %32 = sbr.rel (!%p30_p9) target bundleno = 18 (0x12), region = 147 }
 0x595   : > { %s2297_s22 = smov %s2293_s11 }
 0x597   : > { %s2299_s25 = smov %s2295_s13 }
 0x598   :  { %1217 = vsyncpa [#allocation6], 1 }
 0x599   :  { %1219 = vsyncpa [#allocation6 + $0x1], 1 }
 0x59a   :  { %1220 = vsyncpa [#allocation9], 1 }
 0x59b   :  { %1222 = vsyncpa [#allocation9 + $0x1], 1 }
 0x59c   :  { %1223 = vsyncpa [#allocation12], 1 }
 0x59d   :  { %1224 = vsyncpa [#allocation15], 1 }
 0x59e   :  { %1225 = vsyncpa [#allocation7], 1 }
 0x59f   :  { %1227 = vsyncpa [#allocation7 + $0x1], 1 }

// kernel: tpu_custom_call.1
= control target key start
LH: loop header
LB: loop body
LE: loop exit
PB: predicated region body
PF: predicated region fallthrough
CT: control target
= control target key end

     0   :  { %s2244_s0 = inlined_call_operand.hbm [shape: f32[2,16,32], index: 0, kind: input, shape index: {}]   ;;  %s2245_s1 = inlined_call_operand.hbm [shape: f32[2,1,16], index: 1, kind: input, shape index: {}]   ;;  %s2246_s2 = inlined_call_operand.hbm [shape: bf16[32,32], index: 2, kind: input, shape index: {}]   ;;  %s2247_s3 = inlined_call_operand.hbm [shape: bf16[32,32], index: 3, kind: input, shape index: {}]   ;;  %s2248_s4 = inlined_call_operand.hbm [shape: bf16[32,32], index: 4, kind: input, shape index: {}]   ;;  %s2249_s5 = inlined_call_operand.hbm [shape: bf16[32,32], index: 5, kind: input, shape index: {}]   ;;  %s2250_s6 = inlined_call_operand.vmem [shape: f32[1,32], index: 6, kind: input, shape index: {}]   ;;  %s2251_s7 = inlined_call_operand.vmem [shape: f32[1,32], index: 7, kind: input, shape index: {}]   ;;  %s2252_s8 = inlined_call_operand.vmem [shape: f32[1,32], index: 8, kind: input, shape index: {}]   ;;  %s2253_s9 = inlined_call_operand.vmem [shape: f32[1,32], index: 9, kind: input, shape index: {}]   ;;  %s2254_s10 = inlined_call_operand.vmem [shape: f32[1,32], index: 10, kind: input, shape index: {}]   ;;  %s2255_s11 = inlined_call_operand.vmem [shape: f32[1,32], index: 11, kind: input, shape index: {}]   ;;  %s2256_s12 = inlined_call_operand.hbm [shape: f32[2,16,32], index: 12, kind: output, shape index: {}]  }
   0x1   :  { %2264 = sst [smem:[#allocation29_spill]] %s2246_s2 }
   0x2   :  { %2265 = sst [smem:[#allocation30_spill]] %s2247_s3 }
   0x3   :  { %2266 = sst [smem:[#allocation31_spill]] %s2248_s4 }
   0x4   :  { %2267 = sst [smem:[#allocation32_spill]] %s2249_s5 }
   0x5   :  { %2268 = sst [smem:[#allocation33_spill]] %s2254_s10 }
   0x6   :  { %2269 = sst [smem:[#allocation34_spill]] %s2255_s11 }
   0x7   :  { %2270 = sst [smem:[#allocation35_spill]] %s2256_s12 }
   0x8   :  { %17 = vsyncpa [#allocation6], 0 }
   0x9   :  { %19 = vsyncpa [#allocation6 + $0x1], 0 }
   0xa   :  { %20 = vsyncpa [#allocation9], 0 }
   0xb   :  { %22 = vsyncpa [#allocation9 + $0x1], 0 }
   0xc   :  { %23 = vsyncpa [#allocation12], 0 }
   0xd   :  { %24 = vsyncpa [#allocation15], 0 }
   0xe   :  { %25 = vsyncpa [#allocation7], 0 }
   0xf   :  { %27 = vsyncpa [#allocation7 + $0x1], 0  ;;  %s1968_s21 = smov 0   ;;  %s1970_s22 = smov 0  }
  0x10   :  { %s1972_s23 = smov 0   ;;  %s1974_s24 = smov 0  }
  0x11   :  { %s1976_s25 = smov 0   ;;  %s1978_s26 = smov 0  }
  0x12 LB: > { %2271 = sst [smem:[#allocation23_spill]] %s1865_s21  ;;  %s1999_s27 = sadd.s32 4294967295, %s1885_s26   ;;  %s1885_s26 = sphi %s1978_s26, %s33_s26   ;;  %s1881_s25 = sphi %s1976_s25, %s2299_s25   ;;  %s1877_s24 = sphi %s1974_s24, %s2298_s24   ;;  %s1873_s23 = sphi %s1972_s23, %s2294_s23   ;;  %s1869_s22 = sphi %s1970_s22, %s2297_s22   ;;  %s1865_s21 = sphi %s1968_s21, %s2296_s21  }
  0x13   : > { %2272 = sst [smem:[#allocation24_spill]] %s1873_s23  ;;  %s1340_s28 = sadd.s32 4294967294, %s1885_s26  }
  0x14   : > { %p65_p0 = scmp.ne.s32.totalorder %s1869_s22, %s1865_s21  ;;  %p66_p1 = scmp.eq.s32.totalorder %s1999_s27, 0 }
  0x15   : > { %p327_p2 = scmp.eq.s32.totalorder %s1999_s27, 1  ;;  %p333_p3 = scmp.eq.s32.totalorder %s1340_s28, 1 }
  0x16   : > { %p2008_p4 = por %p66_p1, %p65_p0  ;;  %p1341_p5 = scmp.ge.s32.totalorder %s1885_s26, 1 }
  0x17   : > { %p2013_p6 = por %p333_p3, %p65_p0  ;;  %p340_p7 = scmp.lt.s32.totalorder %s1885_s26, 3 }
  0x18   : > { %s2276_s2 = sld [smem:[#allocation29_spill]]  ;;  %s1887_s17 = smov [#allocation10]  }
  0x19   : > { %s2274_s30 = scalar_select %p2013_p6, 1, 0 }
  0x1a   : > { %p2021_p8 = pnand %p1341_p5, %p340_p7  ;;  %s353_s18 = sshll.u32 %s1887_s17, 4  ;;  %s354_s18 = int_to_ptr.vmem [resolvable:$true] %s353_s18 }
  0x1b   : > { %2275 = sst [smem:[#allocation25_spill]] %s2274_s30  ;;  %p1346_p11 = scmp.ge.s32.totalorder %s1885_s26, 2 }
  0x1c   : > { %p1463_p9 = pneg %p2021_p8  ;;  %s2279_s3 = sld [smem:[#allocation30_spill]] }
  0x1d   : > { %s1888_s14 = smov 64   ;;  %s1890_s17 = smov [#allocation11]  }
  0x1e   : > { %s351_s15 = sshll.u32 %s2276_s2, 4  ;;  %p2029_p10 = pnand %p1463_p9, %p66_p1  ;;  %s352_s15 = int_to_ptr.hbm [resolvable:$true] %s351_s15 }
  0x1f   : > { %s1889_s2 = smov 4   ;;  %s367_s30 = sshll.u32 %s1890_s17, 4  ;;  %s368_s30 = int_to_ptr.vmem [resolvable:$true] %s367_s30 }
  0x20   : > { %1466 = dma.hbm_to_vmem [thread:$0]  (!%p2029_p10), %s352_s15, 256, %s354_s18, [#allocation9], %s1888_s14, %s1888_s14, %s1889_s2  }
  0x21   : > { %s2280_s4 = sld [smem:[#allocation31_spill]]  ;;  %s1891_s18 = smov [#allocation13]  }
  0x22   : > { %s365_s13 = sshll.u32 %s2279_s3, 4  ;;  %s2281_s5 = sld [smem:[#allocation32_spill]]  ;;  %s366_s13 = int_to_ptr.hbm [resolvable:$true] %s365_s13 }
  0x23   : > { %1469 = dma.hbm_to_vmem [thread:$0]  (!%p2029_p10), %s366_s13, 256, %s368_s30, [#allocation12], %s1888_s14, %s1888_s14, %s1889_s2  }
  0x24   : > { %s381_s3 = sshll.u32 %s1891_s18, 4  ;;  %s1892_s12 = smov [#allocation14]   ;;  %s382_s3 = int_to_ptr.vmem [resolvable:$true] %s381_s3 }
  0x25   : > { %s395_s21 = sshll.u32 %s1892_s12, 4  ;;  %s45_s30 = sadd.s32 1, %s1881_s25  ;;  %s396_s21 = int_to_ptr.vmem [resolvable:$true] %s395_s21 }
  0x26   : > { %s52_s13 = sadd.s32 1, %s1873_s23  ;;  %p47_p12 = scmp.ge.s32.totalorder %s45_s30, 2 }
  0x27   : > { %s379_s11 = sshll.u32 %s2280_s4, 4  ;;  %p59_p13 = scmp.ne.s32.totalorder %s1873_s23, %s1869_s22  ;;  %s380_s11 = int_to_ptr.hbm [resolvable:$true] %s379_s11 }
  0x28   : > { %s393_s15 = sshll.u32 %s2281_s5, 4  ;;  %p60_p0 = scmp.eq.s32.totalorder %s1885_s26, 0  ;;  %s394_s15 = int_to_ptr.hbm [resolvable:$true] %s393_s15 }
  0x29   : > { %1472 = dma.hbm_to_vmem [thread:$0]  (!%p2029_p10), %s380_s11, 256, %s382_s3, [#allocation12], %s1888_s14, %s1888_s14, %s1889_s2  }
  0x2a   : > { %1475 = dma.hbm_to_vmem [thread:$0]  (!%p2029_p10), %s394_s15, 256, %s396_s21, [#allocation15], %s1888_s14, %s1888_s14, %s1889_s2  }
  0x2b   : > { %p1491_p3 = scmp.lt.s32.totalorder %s1885_s26, 2  ;;  %s2301_s30 = smov (%p47_p12, %s45_s30), 0 }
  0x2c   : > { %2282 = sst [smem:[#allocation26_spill]] %s2301_s30  ;;  %p2059_p5 = por %p60_p0, %p59_p13 }
  0x2d   : > { %p2065_p7 = por %p327_p2, %p59_p13  ;;  %s49_s2 = ssub.s32 %s1881_s25, %s2301_s30 }
  0x2e   : > { %s427_s19 = sand.u32 1, %s1873_s23   ;;  %p50_p9 = scmp.eq.s32.totalorder %s49_s2, 0 }
  0x2f   : > { %s2284_s11 = scalar_select %p2065_p7, 1, 0 }
  0x30   : > { %s1347_s14 = sshll.u32 %s427_s19, 4  ;;  %s1426_s17 = sshll.u32 %s1881_s25, 4 }
  0x31   : > { %2285 = sst [smem:[#allocation27_spill]] %s2284_s11  ;;  %s436_s18 = scalar_lea.hbm %s2244_s0, %s1426_s17 }
  0x32   : > { %s2074_s20 = scalar_select %p50_p9, %s1873_s23, %s52_s13  }
  0x33   : > { %s437_s12 = sshll.u32 %s436_s18, 4  ;;  %s431_s21 = scalar_lea.vmem [#allocation5], %s1347_s14  ;;  %s438_s12 = int_to_ptr.hbm [resolvable:$true] %s437_s12 }
  0x34   : > { %2286 = sst [smem:[#allocation28_spill]] %s2074_s20  ;;  %s439_s4 = sshll.u32 %s431_s21, 4  ;;  %s440_s4 = int_to_ptr.vmem [resolvable:$true] %s439_s4 }
  0x35   : > { %p1477_p2 = pnand %p1491_p3, %p2059_p5  ;;  %s449_s5 = sand.u32 1, %s1885_s26  }
  0x36   : > { %s428_s30 = scalar_lea.sflag [#allocation6], %s427_s19  ;;  %s1893_s2 = smov 128  }
  0x37   : > { %s1894_s11 = smov 8   ;;  %s455_s20 = scalar_lea.hbm %s2245_s1, %s1881_s25 }
  0x38   : > { %1479 = dma.hbm_to_vmem [thread:$0]  (!%p1477_p2), %s438_s12, 256, %s440_s4, %s428_s30, %s1893_s2, %s1893_s2, %s1894_s11  }
  0x39   : > { %s457_s23 = sshll.u32 %s455_s20, 4  ;;  %s452_s28 = scalar_lea.vmem [#allocation8], %s427_s19  ;;  %s458_s23 = int_to_ptr.hbm [resolvable:$true] %s457_s23 }
  0x3a   : > { %s459_s17 = sshll.u32 %s452_s28, 4  ;;  %s450_s14 = scalar_lea.sflag [#allocation9], %s449_s5  ;;  %s460_s17 = int_to_ptr.vmem [resolvable:$true] %s459_s17 }
  0x3b   : > { %1482 = dma.hbm_to_vmem [thread:$0]  (!%p1477_p2), %s458_s23, 16, %s460_s17, %s450_s14  }
  0x3c   : > { %468 = sbr.rel (%p2021_p8) target bundleno = 1414 (0x586), region = 68  ;;  %s2091_s3 = sand.u32 (!%p2021_p8), 1, %s1869_s22  }
  0x3d   : > { %s1351_s4 = sshll.u32 (!%p2021_p8), %s2091_s3, 4  ;;  %s471_s10 = scalar_lea.sflag (!%p2021_p8), [#allocation6], %s2091_s3 }
  0x3e   : > { %s474_s30 = scalar_lea.vmem (!%p2021_p8), [#allocation5], %s1351_s4 }
  0x41   : > { %1840 = dma.done.wait (%p2008_p4), %s471_s10, 256  }
  0x42   : > { %1842 = vsyncadd (%p2008_p4), %s471_s10, 4294967040  ;;  %s480_s5 = sand.u32 1, %s1999_s27   ;;  %s483_s16 = scalar_lea.vmem [#allocation8], %s2091_s3 }
  0x43   : > { %s481_s23 = scalar_lea.sflag [#allocation9], %s480_s5 }
  0x44   : > { %1844 = dma.done.wait (%p2008_p4), %s481_s23, 16  }
  0x45   : > { %1846 = vsyncadd (%p2008_p4), %s481_s23, 4294967280 }
  0x46   : > { %1848 = dma.done.wait (%p66_p1), [#allocation9], 256  }
  0x47   : > { %1850 = vsyncadd (%p66_p1), [#allocation9], 4294967040 }
  0x48   : > { %1852 = dma.done.wait (%p66_p1), [#allocation12], 512  }
  0x49   : > { %1854 = vsyncadd (%p66_p1), [#allocation12], 4294966784 }
  0x4a   : > { %1856 = dma.done.wait (%p66_p1), [#allocation15], 256  }
  0x4b   : > { %1858 = vsyncadd (%p66_p1), [#allocation15], 4294967040  ;;  %v1428_v0 = vld [vmem:[#allocation11 + $0x8] sm:$0xff]  ;;  %v1427_v1 = vld [vmem:[#allocation11] sm:$0xff]  ;;  %vm578_vm0 = vcmask 261120   ;;  %s1895_s20 = smov 120  }
  0x4c   : > { %v2119_v2 = vld [vmem:[%s474_s30] sm:$0xff]  ;;  %v2121_v3 = vld [vmem:[%s474_s30 + $0x8] sm:$0xff]  ;;  %588 = vmatpush.bf16.msra.mxu0 %v1428_v0  ;;  %s1896_s15 = smov 104   ;;  %s1897_s18 = smov 112   ;;  %vm666_vm1 = vcmask 125952   ;;  %vm737_vm2 = vcmask 1043456  }
  0x4d   : > { %v1432_v4 = vld [vmem:[#allocation10 + $0x8] sm:$0xff]  ;;  %v1431_v5 = vld [vmem:[#allocation10] sm:$0xff]  ;;  %v557_v6 = vpack.c.bf16 %v2121_v3, %v2119_v2  ;;  %v1562_v7 = vld [vmem:[%s2251_s7] ss:$0 sm:$0xff]  ;;  %vm733_vm3 = vcmask 64512   ;;  %vm673_vm4 = vcmask 257024  }
  0x4e   : > { %711 = vmatpush.bf16.msra.mxu2 %v1432_v4  ;;  %v1563_v10 = vld [vmem:[%s2250_s6] ss:$0 sm:$0xff]  ;;  %v1430_v24 = vld [vmem:[#allocation13 + $0x8] sm:$0xff]  ;;  %v1429_v25 = vld [vmem:[#allocation13] sm:$0xff]  ;;  %vm755_vm5 = vcmask 130048   ;;  %vm806_vm6 = vcmask 60416  }
  0x4f   : > { %622 = vmatpush.bf16.msra.mxu1 %v1430_v24  ;;  %v1564_v45 = vld [vmem:[%s2252_s8] ss:$0 sm:$0xff]  ;;  %s1898_s2 = smov 16   ;;  %s1899_s13 = smov 8   ;;  %vm892_vm7 = vcmask 126016   ;;  %vm978_vm8 = vcmask 191616  }
  0x50   : > { %589 = vmatpush.bf16.msra.mxu0 %v1427_v1  ;;  %v1565_v53 = vld [vmem:[%s483_s16] ss:$0 sm:$0xff]  ;;  %s1900_s28 = smov 24   ;;  %vm1064_vm9 = vcmask 257216   ;;  %s2287_s5 = sld [smem:[#allocation33_spill]] }
  0x51   : > { %s2288_s27 = sld [smem:[#allocation34_spill]]  ;;  %s1440_s29 = sshll.u32 %s1877_s24, 4 }
  0x52   : > { %712 = vmatpush.bf16.msra.mxu2 %v1431_v5  ;;  %s548_s11 = scalar_lea.vmem [#allocation16], %s1351_s4  ;;  %s1179_s24 = scalar_lea.sflag [#allocation7], %s2091_s3 }
  0x53   : > { %1365 = vmatmul.msk.bf16.vlgmr.msra.gmra.mxu0 %vm578_vm0, %v557_v6  ;;  %623 = vmatpush.bf16.msra.mxu1 %v1429_v25  ;;  %s1193_s21 = sshll.u32 %s548_s11, 4  ;;  %s1194_s21 = int_to_ptr.vmem [resolvable:$true] %s1193_s21 }
  0x55   : > { %1383 = vmatmul.msk.bf16.vlgmr.msra.gmra.mxu2 %vm578_vm0, %v557_v6 }
  0x56   : > { %1374 = vmatmul.msk.bf16.vlgmr.msra.gmra.mxu1 %vm578_vm0, %v557_v6 }
  0xd0   : > { %v591_v8 = vpop.f32.mrf.mxu0 }
  0xd1   : > { %v592_v9 = vadd.f32 %v1562_v7, %v591_v8 }
  0xd3   : > { %630 = vxpose.xlu0.b32.start [1/2] (short) (narrow) %v592_v9, 32  ;;  %v625_v46 = vpop.f32.mrf.mxu1 }
  0xd4   : > { %v626_v47 = vadd.f32 %v1564_v45, %v625_v46 }
  0xd6   : > { %v671_v48 = vpack.c.bf16 %v626_v47, %v626_v47 }
  0xd8   : > { %v714_v11 = vpop.f32.mrf.mxu2  ;;  %v593_v12 = vpop.f32.mrf.mxu0  ;;  %674 = vst.msk [vmem:[#allocation3] sm:$0xf] %vm673_vm4, %v671_v48 }
  0xd9   : > { %v715_v13 = vadd.f32 %v1563_v10, %v714_v11  ;;  %v594_v14 = vadd.f32 %v1562_v7, %v593_v12 }
  0xdb   : > { %631 = vxpose.xlu0.b32.end [2/2] (short) (narrow) %v594_v14, 32  ;;  %v719_v15 = vmul.f32 0.35355338, %v715_v13  ;;  %v627_v49 = vpop.f32.mrf.mxu1 }
  0xdc   : > { %v628_v50 = vadd.f32 %v1564_v45, %v627_v49 }
  0xdd   : > { %v721_v17 = vpack.c.bf16 %v719_v15, %v719_v15 }
  0xde   : > { %v672_v51 = vpack.c.bf16 %v628_v50, %v628_v50 }
  0xdf   : > { %v730_v20 = vunpack.c.l.b16 %v721_v17 }
  0xe0   : > { %v716_v16 = vpop.f32.mrf.mxu2  ;;  %675 = vst.msk [vmem:[#allocation3 + $0x4] sm:$0xf] %vm673_vm4, %v672_v51 }
  0xe1   : > { %v717_v18 = vadd.f32 %v1563_v10, %v716_v16 }
  0xe3   : > { %v720_v19 = vmul.f32 0.35355338, %v717_v18 }
  0xe5   : > { %v722_v21 = vpack.c.bf16 %v720_v19, %v720_v19 }
  0xe7   : > { %v731_v22 = vunpack.c.l.b16 %v722_v21  ;;  %v1433_v52 = vld [vmem:[#allocation3] sm:$0xff] }
  0xe8   : > { %v1434_v6 = vld [vmem:[#allocation3] sm:$0xff] }
  0xe9   : > { %v732_v23 = vpack.c.b16 %v731_v22, %v730_v20  ;;  %v1435_v14 = vld [vmem:[#allocation3] sm:$0xff] }
  0xea   : > { %v1436_v18 = vld [vmem:[#allocation3] sm:$0xff] }
  0xeb   : > { %810 = vrot.lane.b32.xlu1 %v732_v23, %s1895_s20  ;;  %982 = vrot.lane.b32.xlu2 %v732_v23, %s1896_s15 }
  0xf3   : > { %896 = vrot.lane.b32.xlu1 %v732_v23, %s1897_s18 }
 0x145   : > { %v983_v44 = vpop.permute.xlu2 %982 }
 0x15d   : > { %v811_v34 = vpop.permute.xlu1 %810 }
 0x165   : > { %v897_v41 = vpop.permute.xlu1 %896 }
 0x177   : > { %v646_v26 = vpop.trf.xlu0 }
 0x178   : > { %v662_v27 = vpack.c.bf16 %v646_v26, %v646_v26 }
 0x17a   : > { %667 = vst.msk [vmem:[#allocation2] sm:$0xf] %vm666_vm1, %v662_v27 }
 0x17f   : > { %v647_v28 = vpop.trf.xlu0 }
 0x180   : > { %v663_v29 = vpack.c.bf16 %v647_v28, %v647_v28 }
 0x181   : > { %v724_v30 = vld [vmem:[#allocation2] sm:$0xf] }
 0x182   : > { %668 = vst.msk [vmem:[#allocation2 + $0x4] sm:$0xf] %vm666_vm1, %v663_v29  ;;  %v739_v31 = vsel %vm737_vm2, %v724_v30, 0 }
 0x183   : > { %748 = vmatpush.bf16.msra.mxu3 %v739_v31 }
 0x186   : > { %1384 = vmatmul.msk.bf16.vlgmr.msra.gmra.mxu3 %vm733_vm3, %v732_v23 }
 0x187   : > { %v648_v32 = vpop.trf.xlu0  ;;  %793 = vmatpush.bf16.msrb.mxu3 %v1433_v52 }
 0x188   : > { %v664_v33 = vpack.c.bf16 %v648_v32, %v648_v32 }
 0x189   : > { %v809_v35 = vld [vmem:[#allocation2 + $0x4] sm:$0xf] }
 0x18a   : > { %669 = vst.msk [vmem:[#allocation2 + $0x8] sm:$0xf] %vm666_vm1, %v664_v33  ;;  %v816_v36 = vsel %vm737_vm2, %v809_v35, 0 }
 0x18b   : > { %825 = vmatpush.bf16.msrb.mxu0 %v816_v36 }
 0x18e   : > { %1390 = vmatmul.msk.bf16.vlgmr.msrb.gmra.mxu0 %vm733_vm3, %v811_v34 }
 0x18f   : > { %v649_v37 = vpop.trf.xlu0 }
 0x190   : > { %v665_v38 = vpack.c.bf16 %v649_v37, %v649_v37 }
 0x191   : > { %v895_v39 = vld [vmem:[#allocation2 + $0x8] sm:$0xf] }
 0x192   : > { %670 = vst.msk [vmem:[#allocation2 + $0xc] sm:$0xf] %vm666_vm1, %v665_v38  ;;  %v902_v40 = vsel %vm737_vm2, %v895_v39, 0 }
 0x193   : > { %911 = vmatpush.bf16.msrb.mxu2 %v902_v40 }
 0x196   : > { %1396 = vmatmul.msk.bf16.vlgmr.msrb.gmra.mxu2 %vm733_vm3, %v897_v41 }
 0x199   : > { %v981_v42 = vld [vmem:[#allocation2 + $0xc] sm:$0xf] }
 0x19a   : > { %v988_v43 = vsel %vm737_vm2, %v981_v42, 0 }
 0x19b   : > { %997 = vmatpush.bf16.msra.mxu0 %v988_v43 }
 0x19e   : > { %1402 = vmatmul.msk.bf16.vlgmr.msra.gmra.mxu0 %vm733_vm3, %v983_v44 }
 0x209   : > { %v750_v54 = vpop.f32.mrf.mxu3 }
 0x20a   : > { %v751_v55 = vadd.f32 %v1565_v53, %v750_v54 }
 0x20b   : > { %v827_v56 = vpop.f32.mrf.mxu0 }
 0x20c   : > { %v828_v57 = vadd.f32 %v1565_v53, %v827_v56  ;;  %v756_v58 = vsel %vm755_vm5, %v751_v55, -inf }
 0x20d   : > { %757 = vmax.xlane.f32.xlu2 %v756_v58 }
 0x20e   : > { %v832_v59 = vsel %vm755_vm5, %v828_v57, -inf }
 0x20f   : > { %833 = vmax.xlane.f32.xlu1 %v832_v59 }
 0x211   : > { %v752_v60 = vpop.f32.mrf.mxu3 }
 0x212   : > { %v753_v61 = vadd.f32 %v1565_v53, %v752_v60 }
 0x213   : > { %v829_v63 = vpop.f32.mrf.mxu0 }
 0x214   : > { %v759_v62 = vsel %vm755_vm5, %v753_v61, -inf  ;;  %v830_v16 = vadd.f32 %v1565_v53, %v829_v63 }
 0x215   : > { %760 = vmax.xlane.f32.xlu0 %v759_v62 }
 0x216   : > { %v835_v17 = vsel %vm755_vm5, %v830_v16, -inf }
 0x219   : > { %v913_v0 = vpop.f32.mrf.mxu2 }
 0x21a   : > { %v914_v13 = vadd.f32 %v1565_v53, %v913_v0 }
 0x21b   : > { %v999_v5 = vpop.f32.mrf.mxu0 }
 0x21c   : > { %v1000_v8 = vadd.f32 %v1565_v53, %v999_v5  ;;  %v918_v15 = vsel %vm755_vm5, %v914_v13, -inf }
 0x21e   : > { %v1004_v9 = vsel %vm755_vm5, %v1000_v8, -inf }
 0x221   : > { %v915_v1 = vpop.f32.mrf.mxu2 }
 0x222   : > { %v916_v4 = vadd.f32 %v1565_v53, %v915_v1 }
 0x223   : > { %v1001_v10 = vpop.f32.mrf.mxu0 }
 0x224   : > { %v921_v7 = vsel %vm755_vm5, %v916_v4, -inf  ;;  %v2160_v11 = vadd.f32 %v1565_v53, %v1001_v10 }
 0x225   : > { %858 = vrot.lane.b32.xlu2 %v1434_v6, %s1895_s20  ;;  %922 = vmax.xlane.f32.xlu1 %v921_v7 }
 0x226   : > { %v1007_v12 = vsel %vm755_vm5, %v2160_v11, -inf }
 0x22d   : > { %1005 = vmax.xlane.f32.xlu1 %v1004_v9 }
 0x235   : > { %1008 = vmax.xlane.f32.xlu1 %v1007_v12 }
 0x24e   : > { %919 = vmax.xlane.f32.xlu2 %v918_v15  ;;  %944 = vrot.lane.b32.xlu1 %v1435_v14, %s1897_s18 }
 0x256   : > { %836 = vmax.xlane.f32.xlu2 %v835_v17 }
 0x26e   : > { %1030 = vrot.lane.b32.xlu2 %v1436_v18, %s1896_s15  ;;  %s2289_s15 = sld [smem:[#allocation35_spill]] }
 0x274   : > { %s1192_s12 = scalar_lea.hbm %s2289_s15, %s1440_s29  ;;  %s1807_s10 = scalar_lea.hbm %s2289_s15, 32 }
 0x280   : > { %v758_v19 = vpop.xlane.xlu2 %757 }
 0x281   : > { %v762_v21 = vsub.f32 %v751_v55, %v758_v19 }
 0x282   : > { %v834_v20 = vpop.xlane.xlu1 %833 }
 0x283   : > { %v838_v22 = vsub.f32 %v828_v57, %v834_v20  ;;  %v764_v23 = vmul.f32 1.442695, %v762_v21 }
 0x285   : > { %v840_v24 = vmul.f32 1.442695, %v838_v22  ;;  %1569 = vpow2.f32 %v764_v23 }
 0x287   : > { %1571 = vpow2.f32 %v840_v24 }
 0x288   : > { %v859_v25 = vpop.permute.xlu2 %858  ;;  %v761_v26 = vpop.xlane.xlu0 %760 }
 0x289   : > { %v763_v27 = vsub.f32 %v753_v61, %v761_v26  ;;  %871 = vmatpush.bf16.msrb.mxu1 %v859_v25 }
 0x28b   : > { %v766_v28 = vmul.f32 1.442695, %v763_v27  ;;  %v1570_v29 = vpop.eup %1569 }
 0x28c   : > { %v768_v39 = vsel %vm755_vm5, %v1570_v29, 0.0 }
 0x28d   : > { %1573 = vpow2.f32 %v766_v28  ;;  %v1572_v30 = vpop.eup %1571 }
 0x28e   : > { %v844_v33 = vsel %vm755_vm5, %v1572_v30, 0.0 }
 0x293   : > { %v1574_v31 = vpop.eup %1573 }
 0x294   : > { %v774_v32 = vpack.c.bf16 %v1574_v31, %v1570_v29  ;;  %v771_v0 = vsel %vm755_vm5, %v1574_v31, 0.0 }
 0x296   : > { %1389 = vmatmul.msk.bf16.vlgmr.msrb.gmra.mxu3 %vm755_vm5, %v774_v32 }
 0x297   : > { %845 = vadd.xlane.f32.xlu2 %v844_v33 }
 0x298   : > { %v923_v34 = vpop.xlane.xlu1 %922 }
 0x299   : > { %v925_v35 = vsub.f32 %v916_v4, %v923_v34 }
 0x29b   : > { %v928_v36 = vmul.f32 1.442695, %v925_v35 }
 0x29d   : > { %1575 = vpow2.f32 %v928_v36 }
 0x2a0   : > { %v1006_v40 = vpop.xlane.xlu1 %1005 }
 0x2a1   : > { %v1010_v45 = vsub.f32 %v1000_v8, %v1006_v40 }
 0x2a3   : > { %v1576_v37 = vpop.eup %1575  ;;  %v1012_v47 = vmul.f32 1.442695, %v1010_v45  ;;  %v1438_v45 = vld [vmem:[#allocation14] sm:$0xff] }
 0x2a4   : > { %v933_v38 = vsel %vm755_vm5, %v1576_v37, 0.0 }
 0x2a5   : > { %934 = vadd.xlane.f32.xlu0 %v933_v38 }
 0x2a8   : > { %v1009_v41 = vpop.xlane.xlu1 %1008 }
 0x2a9   : > { %v1011_v51 = vsub.f32 %v2160_v11, %v1009_v41 }
 0x2ab   : > { %v1014_v55 = vmul.f32 1.442695, %v1011_v51 }
 0x2ad   : > { %769 = vadd.xlane.f32.xlu0 %v768_v39 }
 0x2c0   : > { %v945_v42 = vpop.permute.xlu1 %944 }
 0x2c1   : > { %v920_v43 = vpop.xlane.xlu2 %919  ;;  %957 = vmatpush.bf16.msra.mxu3 %v945_v42 }
 0x2c2   : > { %v924_v44 = vsub.f32 %v914_v13, %v920_v43 }
 0x2c4   : > { %v926_v46 = vmul.f32 1.442695, %v924_v44  ;;  %v1439_v44 = vld [vmem:[#allocation14 + $0x8] sm:$0xff] }
 0x2c5   : > { %1103 = vmatpush.bf16.msra.mxu2 %v1439_v44 }
 0x2c6   : > { %1577 = vpow2.f32 %v926_v46 }
 0x2c7   : > { %1579 = vpow2.f32 %v1012_v47 }
 0x2c9   : > { %v837_v48 = vpop.xlane.xlu2 %836  ;;  %1104 = vmatpush.bf16.msra.mxu2 %v1438_v45 }
 0x2ca   : > { %v839_v49 = vsub.f32 %v830_v16, %v837_v48 }
 0x2cc   : > { %v1578_v50 = vpop.eup %1577  ;;  %v842_v52 = vmul.f32 1.442695, %v839_v49 }
 0x2cd   : > { %v936_v53 = vpack.c.bf16 %v1576_v37, %v1578_v50  ;;  %v930_v54 = vsel %vm755_vm5, %v1578_v50, 0.0  ;;  %v1580_v57 = vpop.eup %1579 }
 0x2ce   : > { %1581 = vpow2.f32 %v842_v52  ;;  %931 = vadd.xlane.f32.xlu2 %v930_v54  ;;  %v1016_v60 = vsel %vm755_vm5, %v1580_v57, 0.0 }
 0x2cf   : > { %1401 = vmatmul.msk.bf16.vlgmr.msra.gmra.mxu3 %vm755_vm5, %v936_v53  ;;  %1583 = vpow2.f32 %v1014_v55  ;;  %v1566_v53 = vld [vmem:[%s2253_s9] ss:$0 sm:$0xff] }
 0x2d1   : > { %v1031_v56 = vpop.permute.xlu2 %1030 }
 0x2d2   : > { %1043 = vmatpush.bf16.msra.mxu1 %v1031_v56 }
 0x2d4   : > { %v1582_v58 = vpop.eup %1581 }
 0x2d5   : > { %v847_v59 = vsel %vm755_vm5, %v1582_v58, 0.0  ;;  %v850_v61 = vpack.c.bf16 %v1582_v58, %v1572_v30  ;;  %v1584_v62 = vpop.eup %1583 }
 0x2d6   : > { %848 = vadd.xlane.f32.xlu1 %v847_v59  ;;  %1017 = vadd.xlane.f32.xlu2 %v1016_v60  ;;  %v1019_v63 = vsel %vm755_vm5, %v1584_v62, 0.0  ;;  %v1022_v1 = vpack.c.bf16 %v1584_v62, %v1580_v57  ;;  %v1901_v62 = vmov 32.0  }
 0x2d7   : > { %1395 = vmatmul.msk.bf16.vlgmr.msrb.gmra.mxu1 %vm755_vm5, %v850_v61 }
 0x2de   : > { %1020 = vadd.xlane.f32.xlu1 %v1019_v63  ;;  %772 = vadd.xlane.f32.xlu2 %v771_v0 }
 0x2e7   : > { %1407 = vmatmul.msk.bf16.vlgmr.msra.gmra.mxu1 %vm755_vm5, %v1022_v1 }
 0x30a   : > { %v846_v10 = vpop.xlane.xlu2 %845 }
 0x318   : > { %v935_v4 = vpop.xlane.xlu0 %934 }
 0x319   : > { %v795_v7 = vpop.f32.mrf.mxu3 }
 0x320   : > { %v770_v5 = vpop.xlane.xlu0 %769 }
 0x321   : > { %1585 = vrcp.f32 %v770_v5  ;;  %v797_v13 = vpop.f32.mrf.mxu3 }
 0x327   : > { %v1586_v6 = vpop.eup %1585 }
 0x328   : > { %v802_v8 = vmul.f32 %v1586_v6, %v795_v7 }
 0x32a   : > { %v804_v9 = vpack.c.bf16 %v802_v8, %v802_v8 }
 0x32c   : > { %807 = vst.msk [vmem:[#allocation4] sm:$0xf] %vm806_vm6, %v804_v9 }
 0x341   : > { %v932_v11 = vpop.xlane.xlu2 %931 }
 0x342   : > { %1587 = vrcp.f32 %v932_v11 }
 0x343   : > { %1589 = vrcp.f32 %v846_v10 }
 0x348   : > { %v1588_v15 = vpop.eup %1587 }
 0x349   : > { %v1018_v12 = vpop.xlane.xlu2 %1017  ;;  %v849_v17 = vpop.xlane.xlu1 %848 }
 0x34a   : > { %v1590_v19 = vpop.eup %1589 }
 0x351   : > { %v773_v14 = vpop.xlane.xlu2 %772  ;;  %v1021_v33 = vpop.xlane.xlu1 %1020 }
 0x352   : > { %v959_v16 = vpop.f32.mrf.mxu3  ;;  %1591 = vrcp.f32 %v773_v14 }
 0x353   : > { %v966_v18 = vmul.f32 %v1588_v15, %v959_v16  ;;  %1593 = vrcp.f32 %v849_v17 }
 0x354   : > { %v873_v20 = vpop.f32.mrf.mxu1  ;;  %1595 = vrcp.f32 %v935_v4 }
 0x355   : > { %v968_v21 = vpack.c.bf16 %v966_v18, %v966_v18  ;;  %v880_v22 = vmul.f32 %v1590_v19, %v873_v20  ;;  %1597 = vrcp.f32 %v1018_v12 }
 0x356   : > { %1599 = vrcp.f32 %v1021_v33 }
 0x357   : > { %v882_v23 = vpack.c.bf16 %v880_v22, %v880_v22  ;;  %972 = vrot.lane.b32.xlu2 %v968_v21, %s1898_s2  ;;  %1601 = vrcp.f32 %v1901_v62 }
 0x358   : > { %v1592_v24 = vpop.eup %1591 }
 0x359   : > { %886 = vrot.lane.b32.xlu1 %v882_v23, %s1899_s13  ;;  %v803_v25 = vmul.f32 %v1592_v24, %v797_v13  ;;  %v1594_v26 = vpop.eup %1593 }
 0x35a   : > { %v961_v31 = vpop.f32.mrf.mxu3  ;;  %v1596_v32 = vpop.eup %1595 }
 0x35b   : > { %v805_v27 = vpack.c.bf16 %v803_v25, %v803_v25  ;;  %v967_v34 = vmul.f32 %v1596_v32, %v961_v31  ;;  %v1598_v35 = vpop.eup %1597  ;;  %v1568_v32 = vld [vmem:[%s2288_s27] ss:$0 sm:$0xff] }
 0x35c   : > { %v875_v28 = vpop.f32.mrf.mxu1  ;;  %v1600_v40 = vpop.eup %1599 }
 0x35d   : > { %v881_v29 = vmul.f32 %v1594_v26, %v875_v28  ;;  %808 = vst.msk [vmem:[#allocation4 + $0x4] sm:$0xf] %vm806_vm6, %v805_v27  ;;  %v969_v38 = vpack.c.bf16 %v967_v34, %v967_v34  ;;  %v1602_v63 = vpop.eup %1601  ;;  %v1567_v27 = vld [vmem:[%s2287_s5] ss:$0 sm:$0xff] }
 0x35e   : > { %v1122_v0 = vmul.f32 32.0, %v1602_v63  ;;  %vm1126_vm10 = vweird.f32 %v1602_v63 }
 0x35f   : > { %v883_v30 = vpack.c.bf16 %v881_v29, %v881_v29 }
 0x360   : > { %v1123_v1 = vsub.f32 1.0, %v1122_v0 }
 0x361   : > { %888 = vrot.lane.b32.xlu0 %v883_v30, %s1899_s13 }
 0x362   : > { %v1124_v4 = vmul.f32 %v1602_v63, %v1123_v1 }
 0x364   : > { %v1045_v36 = vpop.f32.mrf.mxu1  ;;  %v1125_v5 = vadd.f32 %v1602_v63, %v1124_v4 }
 0x365   : > { %v1052_v37 = vmul.f32 %v1598_v35, %v1045_v36 }
 0x366   : > { %v1127_v6 = vsel %vm1126_vm10, %v1602_v63, %v1125_v5 }
 0x367   : > { %v1054_v39 = vpack.c.bf16 %v1052_v37, %v1052_v37 }
 0x369   : > { %1058 = vrot.lane.b32.xlu1 %v1054_v39, %s1900_s28  ;;  %974 = vrot.lane.b32.xlu0 %v969_v38, %s1898_s2  ;;  %s1195_s2 = sshll.u32 %s1192_s12, 4  ;;  %s1196_s2 = int_to_ptr.hbm [resolvable:$true] %s1195_s2 }
 0x36c   : > { %v1047_v41 = vpop.f32.mrf.mxu1 }
 0x36d   : > { %v1053_v42 = vmul.f32 %v1600_v40, %v1047_v41 }
 0x36f   : > { %v1055_v43 = vpack.c.bf16 %v1053_v42, %v1053_v42 }
 0x371   : > { %1060 = vrot.lane.b32.xlu2 %v1055_v43, %s1900_s28  ;;  %s1801_s28 = sshra.s32 %s1196_s2, 4  ;;  %s1802_s28 = int_to_ptr.hbm [resolvable:$true] %s1801_s28 }
 0x372   : > { %s1803_s4 = scalar_lea.hbm %s1802_s28, 16  ;;  %p1808_p10 = scmp.lt.s32.totalorder %s1802_s28, %s2289_s15 }
 0x373   : > { %p1804_p1 = scmp.ne.s32.totalorder %s1802_s28, %s1803_s4  ;;  %p1809_p12 = scmp.lt.s32.totalorder %s1807_s10, %s1803_s4 }
 0x375   : > { %p1805_p4 = pnand %p1804_p1, %p2065_p7  ;;  %p1810_p13 = por %p1809_p12, %p1808_p10 }
 0x377   : > { %p1806_p8 = pneg %p1805_p4 }
 0x379   : > { %p1811_p0 = pnand %p1810_p13, %p1806_p8 }
 0x3b1   : > { %v973_v47 = vpop.permute.xlu2 %972 }
 0x3cb   : > { %v887_v46 = vpop.permute.xlu1 %886  ;;  %v1061_v51 = vpop.permute.xlu2 %1060 }
 0x3cc   : > { %893 = vst.msk [vmem:[#allocation4] sm:$0xf] %vm892_vm7, %v887_v46 }
 0x3cd   : > { %979 = vst.msk [vmem:[#allocation4] sm:$0xf] %vm978_vm8, %v973_v47 }
 0x3d3   : > { %v889_v48 = vpop.permute.xlu0 %888 }
 0x3d4   : > { %894 = vst.msk [vmem:[#allocation4 + $0x4] sm:$0xf] %vm892_vm7, %v889_v48 }
 0x3db   : > { %v1059_v49 = vpop.permute.xlu1 %1058  ;;  %v975_v50 = vpop.permute.xlu0 %974 }
 0x3dc   : > { %1065 = vst.msk [vmem:[#allocation4] sm:$0xf] %vm1064_vm9, %v1059_v49 }
 0x3dd   : > { %980 = vst.msk [vmem:[#allocation4 + $0x4] sm:$0xf] %vm978_vm8, %v975_v50 }
 0x3de   : > { %1066 = vst.msk [vmem:[#allocation4 + $0x4] sm:$0xf] %vm1064_vm9, %v1061_v51 }
 0x3e5   : > { %v1437_v52 = vld [vmem:[#allocation4] sm:$0xff] }
 0x3e6   : > { %1420 = vmatmul.msk.bf16.vlgmr.msra.gmra.mxu2 %vm578_vm0, %v1437_v52 }
 0x469   : > { %v1106_v54 = vpop.f32.mrf.mxu2 }
 0x46a   : > { %v1107_v55 = vadd.f32 %v1566_v53, %v1106_v54 }
 0x46c   : > { %v1111_v56 = vadd.f32 %v1107_v55, %v2119_v2 }
 0x46e   : > { %v1115_v57 = vsel %vm578_vm0, %v1111_v56, 0.0 }
 0x46f   : > { %1116 = vadd.xlane.f32.xlu0 %v1115_v57 }
 0x471   : > { %v1108_v58 = vpop.f32.mrf.mxu2 }
 0x472   : > { %v1109_v59 = vadd.f32 %v1566_v53, %v1108_v58 }
 0x474   : > { %v1112_v60 = vadd.f32 %v1109_v59, %v2121_v3 }
 0x476   : > { %v1118_v61 = vsel %vm578_vm0, %v1112_v60, 0.0 }
 0x477   : > { %1119 = vadd.xlane.f32.xlu1 %v1118_v61 }
 0x4e2   : > { %v1117_v2 = vpop.xlane.xlu0 %1116 }
 0x4e3   : > { %v1128_v7 = vmul.f32 %v1127_v6, %v1117_v2 }
 0x4e5   : > { %v1130_v8 = vsub.f32 %v1111_v56, %v1128_v7 }
 0x4e7   : > { %v1132_v9 = vmul.f32 %v1130_v8, %v1130_v8 }
 0x4e9   : > { %v1134_v10 = vsel %vm578_vm0, %v1132_v9, 0.0 }
 0x4ea   : > { %v1120_v11 = vpop.xlane.xlu1 %1119  ;;  %1135 = vadd.xlane.f32.xlu2 %v1134_v10 }
 0x4eb   : > { %v1129_v3 = vmul.f32 %v1127_v6, %v1120_v11 }
 0x4ed   : > { %v1131_v12 = vsub.f32 %v1112_v60, %v1129_v3 }
 0x4ef   : > { %v1133_v13 = vmul.f32 %v1131_v12, %v1131_v12 }
 0x4f1   : > { %v1137_v14 = vsel %vm578_vm0, %v1133_v13, 0.0 }
 0x4f2   : > { %1138 = vadd.xlane.f32.xlu0 %v1137_v14 }
 0x55d   : > { %v1136_v15 = vpop.xlane.xlu2 %1135 }
 0x55e   : > { %v1140_v16 = vmul.f32 %v1136_v15, %v1127_v6 }
 0x560   : > { %v1142_v17 = vadd.f32 1e-12, %v1140_v16 }
 0x562   : > { %1603 = vrsqrt.f32 %v1142_v17  ;;  %vm1150_vm12 = vweird.f32 %v1142_v17 }
 0x565   : > { %v1139_v18 = vpop.xlane.xlu0 %1138 }
 0x566   : > { %v1141_v19 = vmul.f32 %v1139_v18, %v1127_v6 }
 0x568   : > { %v1604_v20 = vpop.eup %1603  ;;  %v1143_v21 = vadd.f32 1e-12, %v1141_v19 }
 0x569   : > { %v1145_v22 = vmul.f32 %v1604_v20, %v1142_v17  ;;  %vm1151_vm11 = vweird.f32 %v1604_v20 }
 0x56a   : > { %1605 = vrsqrt.f32 %v1143_v21  ;;  %vm1152_vm13 = vmor %vm1150_vm12, %vm1151_vm11  ;;  %vm1160_vm15 = vweird.f32 %v1143_v21 }
 0x56b   : > { %v1146_v23 = vmul.f32 %v1604_v20, %v1145_v22 }
 0x56d   : > { %v1147_v24 = vmul.f32 0.5, %v1146_v23 }
 0x56f   : > { %v1148_v25 = vsub.f32 1.5, %v1147_v24 }
 0x570   : > { %v1606_v26 = vpop.eup %1605 }
 0x571   : > { %v1149_v28 = vmul.f32 %v1604_v20, %v1148_v25  ;;  %v1155_v29 = vmul.f32 %v1606_v26, %v1143_v21  ;;  %vm1161_vm14 = vweird.f32 %v1606_v26 }
 0x572   : > { %vm1162_vm1 = vmor %vm1160_vm15, %vm1161_vm14 }
 0x573   : > { %v1153_v30 = vsel %vm1152_vm13, %v1604_v20, %v1149_v28  ;;  %v1156_v31 = vmul.f32 %v1606_v26, %v1155_v29 }
 0x574   : > { %v1167_v33 = vmul.f32 %v1567_v27, %v1153_v30 }
 0x575   : > { %v1157_v34 = vmul.f32 0.5, %v1156_v31 }
 0x576   : > { %v1169_v35 = vmul.f32 %v1167_v33, %v1130_v8 }
 0x577   : > { %v1158_v36 = vsub.f32 1.5, %v1157_v34 }
 0x578   : > { %v1174_v37 = vadd.f32 %v1568_v32, %v1169_v35 }
 0x579   : > { %v1159_v38 = vmul.f32 %v1606_v26, %v1158_v36 }
 0x57a   : > { %1176 = vst.msk [vmem:[%s548_s11] sm:$0xff] %vm578_vm0, %v1174_v37 }
 0x57b   : > { %v1163_v39 = vsel %vm1162_vm1, %v1606_v26, %v1159_v38 }
 0x57c   : > { %v1168_v40 = vmul.f32 %v1567_v27, %v1163_v39 }
 0x57e   : > { %v1170_v41 = vmul.f32 %v1168_v40, %v1131_v12 }
 0x580   : > { %v1175_v42 = vadd.f32 %v1568_v32, %v1170_v41 }
 0x582   : > { %1177 = vst.msk [vmem:[%s548_s11 + $0x8] sm:$0xff] %vm578_vm0, %v1175_v42 }
 0x583   : > { %1814 = shalt.err (!%p1811_p0)
}
 0x584   : > { %s1902_s3 = smov 128  }
 0x585   : > { %1461 = dma.vmem_to_hbm [thread:$0]  (%p2065_p7), %s1194_s21, 256, %s1196_s2, %s1179_s24, %s1902_s3, %s1902_s3, %s1899_s13  }
 0x586 PF: > { %s2291_s23 = sld [smem:[#allocation23_spill]]  ;;  %p1484_p3 = pnand %p1346_p11, %p2013_p6 }
 0x588   : > { %p1485_p5 = pneg %p1484_p3 }
 0x58c   : > { %s1210_s27 = sand.u32 1, %s2291_s23  }
 0x58d   : > { %s1211_s29 = scalar_lea.sflag [#allocation7], %s1210_s27 }
 0x58e   : > { %1860 = dma.done.wait (%p1485_p5), %s1211_s29, 256  }
 0x58f   : > { %1862 = vsyncadd (%p1485_p5), %s1211_s29, 4294967040  ;;  %s33_s26 = sadd.s32 1, %s1885_s26   ;;  %s2293_s11 = sld [smem:[#allocation24_spill]] }
 0x590   : > { %p30_p9 = scmp.ge.s32.totalorder %s33_s26, 4   ;;  %s2294_s23 = sld [smem:[#allocation28_spill]] }
 0x591   : > { %s2295_s13 = sld [smem:[#allocation26_spill]]  ;;  %s2296_s21 = smov %s1869_s22 }
 0x592   : > { %s2298_s24 = smov %s1881_s25 }
 0x593   :  { %32 = sbr.rel (!%p30_p9) target bundleno = 18 (0x12), region = 147 }
 0x595   : > { %s2297_s22 = smov %s2293_s11 }
 0x597   : > { %s2299_s25 = smov %s2295_s13 }
 0x598   :  { %1217 = vsyncpa [#allocation6], 1 }
 0x599   :  { %1219 = vsyncpa [#allocation6 + $0x1], 1 }
 0x59a   :  { %1220 = vsyncpa [#allocation9], 1 }
 0x59b   :  { %1222 = vsyncpa [#allocation9 + $0x1], 1 }
 0x59c   :  { %1223 = vsyncpa [#allocation12], 1 }
 0x59d   :  { %1224 = vsyncpa [#allocation15], 1 }
 0x59e   :  { %1225 = vsyncpa [#allocation7], 1 }
 0x59f   :  { %1227 = vsyncpa [#allocation7 + $0x1], 1 }

</bundles_post_ra>
